<compile_context>
chip_gen: v7x
topology: tpu7x:2x2x1
jax: 0.10.0
libtpu: 0.0.40
codegen_flags: <defaults>
</compile_context>

<pallas_src>
import functools

import jax
import jax.numpy as jnp
from jax.experimental import pallas as pl
from jax.experimental.pallas import tpu as pltpu


def _round_up(x, m):
    return ((x + m - 1) // m) * m


def _vmem_budget_bytes():
    """~75% of this generation's per-core VMEM (96 MiB v5e/v6e, 48 MiB v7x)."""
    cap = 64 * 1024 * 1024  # conservative default = v7x per-TensorCore VMEM
    try:
        cap = int(getattr(pltpu.get_tpu_info(), "vmem_capacity_bytes", cap))
    except Exception:
        pass
    return (cap * 3) // 4


def simclr_kernel(x_ref,
                  w1_ref, b1_ref,   # encoder fc1 (large, K-tiled / streamed)
                  w2_ref, b2_ref,   # encoder fc2 (-> feature dim), resident
                  w3_ref, b3_ref,   # projector linear 1, resident
                  w4_ref, b4_ref,   # projector linear 2, resident
                  o_ref,
                  acc_ref,          # f32 VMEM accumulator (tm, hidden_p)
                  *, compute_dtype):
    k = pl.program_id(1)

    @pl.when(k == 0)
    def _():
        acc_ref[...] = jnp.zeros_like(acc_ref)

    # Layer-1 partial product for this K tile.  x is cast to the compute dtype
    # in-kernel (avoids a wrapper-side full-HBM pad/cast pass); f32 accumulate.
    acc_ref[...] += jnp.dot(x_ref[...].astype(compute_dtype), w1_ref[...],
                            preferred_element_type=jnp.float32)

    # Finalize after the full K reduction: bias + ReLU, then the small
    # encoder-fc2 and projector matmuls fused here.
    @pl.when(k == pl.num_programs(1) - 1)
    def _():
        h = jnp.maximum(acc_ref[...] + b1_ref[...], 0.0)
        feat = jnp.dot(h.astype(compute_dtype), w2_ref[...],
                       preferred_element_type=jnp.float32) + b2_ref[...]
        p = jnp.maximum(
            jnp.dot(feat.astype(compute_dtype), w3_ref[...],
                    preferred_element_type=jnp.float32) + b3_ref[...], 0.0)
        out = jnp.dot(p.astype(compute_dtype), w4_ref[...],
                      preferred_element_type=jnp.float32) + b4_ref[...]
        o_ref[...] = out.astype(o_ref.dtype)


def prepare_params(params, *, compute_dtype=jnp.bfloat16):
    """Pad / cast the weights ONCE (hoisted out of the per-step forward)."""
    (w1, b1), (w2, b2), (w3, b3), (w4, b4) = params
    in_dim, hidden = w1.shape
    feat_dim = w2.shape[1]
    proj_dim = w4.shape[1]

    in_dim_p = _round_up(in_dim, 128)
    hidden_p = _round_up(hidden, 128)
    feat_p = _round_up(feat_dim, 128)
    proj_p = _round_up(proj_dim, 128)

    def pad2(a, rows, cols, dtype):
        return jnp.pad(a, ((0, rows - a.shape[0]),
                           (0, cols - a.shape[1]))).astype(dtype)

    return dict(
        w1=pad2(w1, in_dim_p, hidden_p, compute_dtype),
        b1=pad2(b1, 1, hidden_p, jnp.float32),
        w2=pad2(w2, hidden_p, feat_p, compute_dtype),
        b2=pad2(b2, 1, feat_p, jnp.float32),
        w3=pad2(w3, feat_p, proj_p, compute_dtype),
        b3=pad2(b3, 1, proj_p, jnp.float32),
        w4=pad2(w4, proj_p, proj_p, compute_dtype),
        b4=pad2(b4, 1, proj_p, jnp.float32),
        dims=(in_dim, hidden, feat_dim, proj_dim),
        compute_dtype=compute_dtype,
    )


def simclr_forward(x_nchw, prepared):
    """x_nchw: (B, C, H, W).  Returns (B, projection_dim) float32."""
    compute_dtype = prepared["compute_dtype"]
    in_dim, hidden, feat_dim, proj_dim = prepared["dims"]
    w1p, b1p = prepared["w1"], prepared["b1"]
    w2p, b2p = prepared["w2"], prepared["b2"]
    w3p, b3p = prepared["w3"], prepared["b3"]
    w4p, b4p = prepared["w4"], prepared["b4"]
    in_dim_p, hidden_p = w1p.shape
    feat_p = w2p.shape[1]
    proj_p = w4p.shape[1]

    B = x_nchw.shape[0]
    x_flat = x_nchw.reshape(B, -1)          # flatten NCHW -> (B, C*H*W)
    assert x_flat.shape[1] == in_dim

    x_bytes = jnp.dtype(x_flat.dtype).itemsize
    w_bytes = jnp.dtype(compute_dtype).itemsize
    out_bytes = jnp.dtype(compute_dtype).itemsize
    vmem_budget = _vmem_budget_bytes()

    def vmem_need(tm_, tk_):
        acc = tm_ * hidden_p * 4
        x_buf = 2 * tm_ * tk_ * x_bytes              # double-buffered x stream
        w1_buf = 2 * tk_ * hidden_p * w_bytes        # double-buffered w1 stream
        resident = ((hidden_p * feat_p + feat_p * proj_p + proj_p * proj_p)
                    * w_bytes + (hidden_p + feat_p + 2 * proj_p) * 4)
        out_buf = 2 * tm_ * proj_p * out_bytes
        return acc + x_buf + w1_buf + resident + out_buf

    # Batch tile: large enough to amortize w1 streaming (dominant HBM traffic)
    # but split small batches in two so the "parallel" axis spans both v7x
    # TensorCores.  Multiple of 16 keeps bf16 tiles fully packed.
    b_pad16 = _round_up(B, 16)
    if b_pad16 >= 1024:
        tm = 512
    elif b_pad16 >= 32:
        tm = _round_up(b_pad16 // 2, 16)
    else:
        tm = b_pad16

    # K tile: largest multiple of 128 dividing in_dim_p that fits the budget.
    def pick_tk(tm_):
        for cand in (2048, 1024, 512, 256, 128):
            if in_dim_p % cand == 0 and vmem_need(tm_, cand) <= vmem_budget:
                return cand
        return None

    tk = pick_tk(tm)
    while tk is None and tm > 16:
        tm = max(16, _round_up(tm // 2, 16))
        tk = pick_tk(tm)
    if tk is None:
        # TODO(synk): for very large hidden widths (>=4096) on v7x, add an
        # N-grid axis over hidden_p instead of shrinking tm further.
        tk = 128

    b_pad = _round_up(B, tm)
    grid_m = b_pad // tm
    grid_k = in_dim_p // tk

    # Pad x only when needed; no dtype cast here (done in-kernel).
    if b_pad != B or in_dim_p != in_dim:
        xp = jnp.pad(x_flat, ((0, b_pad - B), (0, in_dim_p - in_dim)))
    else:
        xp = x_flat

    flops = 2 * b_pad * (in_dim_p * hidden_p + hidden_p * feat_p
                         + feat_p * proj_p + proj_p * proj_p)
    bytes_accessed = int(xp.size * x_bytes
                         + w1p.size * w_bytes * grid_m
                         + (w2p.size + w3p.size + w4p.size) * w_bytes
                         + (b1p.size + b2p.size + b3p.size + b4p.size) * 4
                         + b_pad * proj_p * out_bytes)

    def build(single_buffer_resident):
        if single_buffer_resident:
            const = lambda shape: pl.BlockSpec(shape, lambda i, k: (0, 0),
                                               pipeline_mode=pl.Buffered(1))
        else:
            const = lambda shape: pl.BlockSpec(shape, lambda i, k: (0, 0))
        grid_spec = pltpu.PrefetchScalarGridSpec(
            num_scalar_prefetch=0,
            grid=(grid_m, grid_k),
            in_specs=[
                pl.BlockSpec((tm, tk), lambda i, k: (i, k)),          # x tile
                pl.BlockSpec((tk, hidden_p), lambda i, k: (k, 0)),    # w1 tile
                const((1, hidden_p)),                                 # b1
                const((hidden_p, feat_p)),                            # w2
                const((1, feat_p)),                                   # b2
                const((feat_p, proj_p)),                              # w3
                const((1, proj_p)),                                   # b3
                const((proj_p, proj_p)),                              # w4
                const((1, proj_p)),                                   # b4
            ],
            out_specs=pl.BlockSpec((tm, proj_p), lambda i, k: (i, 0)),
            scratch_shapes=[pltpu.VMEM((tm, hidden_p), jnp.float32)],
        )
        return pl.pallas_call(
            functools.partial(simclr_kernel, compute_dtype=compute_dtype),
            out_shape=jax.ShapeDtypeStruct((b_pad, proj_p), compute_dtype),
            grid_spec=grid_spec,
            compiler_params=pltpu.CompilerParams(
                dimension_semantics=("parallel", "arbitrary"),
                vmem_limit_bytes=int(vmem_budget),
            ),
            cost_estimate=pl.CostEstimate(flops=flops, transcendentals=0,
                                          bytes_accessed=bytes_accessed),
        )

    args = (xp, w1p, b1p, w2p, b2p, w3p, b3p, w4p, b4p)
    try:
        # Resident operands (constant index maps) single-buffered to halve
        # their VMEM footprint (matters on v7x's 64 MiB VMEM).
        out_padded = jax.block_until_ready(build(True)(*args))
    except Exception:
        out_padded = jax.block_until_ready(build(False)(*args))

    return out_padded[:B, :proj_dim].astype(jnp.float32)


def make_params(key, in_dim, hidden_dim, feat_dim, proj_dim):
    """Deterministic parameters (weights as (in, out), biases as (1, out))."""
    ks = jax.random.split(key, 8)

    def linear(kw, kb, fan_in, fan_out):
        scale = 1.0 / jnp.sqrt(jnp.float32(fan_in))
        w = jax.random.uniform(kw, (fan_in, fan_out), jnp.float32, -scale, scale)
        b = jax.random.uniform(kb, (1, fan_out), jnp.float32, -scale, scale)
        return w, b

    p_enc1 = linear(ks[0], ks[1], in_dim, hidden_dim)     # encoder fc1
    p_enc2 = linear(ks[2], ks[3], hidden_dim, feat_dim)   # encoder fc_layers[-1]
    p_proj1 = linear(ks[4], ks[5], feat_dim, proj_dim)    # projector[0]
    p_proj2 = linear(ks[6], ks[7], proj_dim, proj_dim)    # projector[2]
    return (p_enc1, p_enc2, p_proj1, p_proj2)


def reference_forward(x_flat, params, compute_dtype=jnp.bfloat16):
    """Pure-JAX reference with the same bf16-in / f32-accumulate contract."""
    (w1, b1), (w2, b2), (w3, b3), (w4, b4) = params
    c = lambda a: a.astype(compute_dtype)
    h = jnp.dot(c(x_flat), c(w1), preferred_element_type=jnp.float32) + b1
    h = jnp.maximum(h, 0.0)
    feat = jnp.dot(c(h), c(w2), preferred_element_type=jnp.float32) + b2
    p = jnp.maximum(
        jnp.dot(c(feat), c(w3), preferred_element_type=jnp.float32) + b3, 0.0)
    return jnp.dot(c(p), c(w4), preferred_element_type=jnp.float32) + b4


if __name__ == "__main__":
    # Small shapes: batch=2, channels=4, spatial=16x16, hidden=32,
    # encoder feature dim=32, projection_dim=32.
    B, C, H, W = 2, 4, 16, 16
    hidden_dim, feat_dim, proj_dim = 32, 32, 32
    in_dim = C * H * W

    key = jax.random.PRNGKey(0)
    kx, kp = jax.random.split(key)
    x = jax.random.normal(kx, (B, C, H, W), jnp.float32)
    params = make_params(kp, in_dim, hidden_dim, feat_dim, proj_dim)

    prepared = prepare_params(params)   # one-time weight pad/cast (hoisted)
    out = simclr_forward(x, prepared)
    out = jax.block_until_ready(out)

    ref = reference_forward(x.reshape(B, -1), params)
    assert out.shape == (B, proj_dim)
    max_err = jnp.max(jnp.abs(out - ref))
    assert jnp.allclose(out, ref, atol=2e-2, rtol=2e-2), f"max abs err {max_err}"

    print("KERNEL_OK")
</pallas_src>

<mosaic_0001>
module attributes {stable_mosaic.version = 11 : i64} {
  func.func @simclr_kernel(%arg0: i32, %arg1: i32, %arg2: memref<16x1024xf32, #tpu.memory_space<vmem>>, %arg3: memref<1024x128xbf16, #tpu.memory_space<vmem>>, %arg4: memref<1x128xf32, #tpu.memory_space<vmem>>, %arg5: memref<128x128xbf16, #tpu.memory_space<vmem>>, %arg6: memref<1x128xf32, #tpu.memory_space<vmem>>, %arg7: memref<128x128xbf16, #tpu.memory_space<vmem>>, %arg8: memref<1x128xf32, #tpu.memory_space<vmem>>, %arg9: memref<128x128xbf16, #tpu.memory_space<vmem>>, %arg10: memref<1x128xf32, #tpu.memory_space<vmem>>, %arg11: memref<16x128xbf16, #tpu.memory_space<vmem>>, %arg12: memref<16x128xf32, #tpu.memory_space<vmem>>) attributes {dimension_semantics = [#tpu.dimension_semantics<parallel>, #tpu.dimension_semantics<arbitrary>], iteration_bounds = array<i64: 1, 1>, scalar_prefetch = 0 : i64, scratch_operands = 1 : i64, tpu.core_type = #tpu.core_type<tc>, window_params = [{transform_indices = @transform_0, window_bounds = array<i64: 16, 1024>}, {transform_indices = @transform_1, window_bounds = array<i64: 1024, 128>}, {pipeline_mode = #tpu.pipeline_mode<synchronous>, transform_indices = @transform_2, window_bounds = array<i64: 1, 128>}, {pipeline_mode = #tpu.pipeline_mode<synchronous>, transform_indices = @transform_3, window_bounds = array<i64: 128, 128>}, {pipeline_mode = #tpu.pipeline_mode<synchronous>, transform_indices = @transform_4, window_bounds = array<i64: 1, 128>}, {pipeline_mode = #tpu.pipeline_mode<synchronous>, transform_indices = @transform_5, window_bounds = array<i64: 128, 128>}, {pipeline_mode = #tpu.pipeline_mode<synchronous>, transform_indices = @transform_6, window_bounds = array<i64: 1, 128>}, {pipeline_mode = #tpu.pipeline_mode<synchronous>, transform_indices = @transform_7, window_bounds = array<i64: 128, 128>}, {pipeline_mode = #tpu.pipeline_mode<synchronous>, transform_indices = @transform_8, window_bounds = array<i64: 1, 128>}, {transform_indices = @transform_9, window_bounds = array<i64: 16, 128>}]} {
    %c0_i32 = arith.constant 0 : i32
    %0 = arith.cmpi eq, %arg1, %c0_i32 : i32
    %1 = arith.extui %0 : i1 to i32
    %c0_i32_0 = arith.constant 0 : i32
    %2 = arith.cmpi ne, %1, %c0_i32_0 : i32
    scf.if %2 {
      %cst_10 = arith.constant 0.000000e+00 : f32
      %13 = vector.broadcast %cst_10 : f32 to vector<16x128xf32>
      %c0_11 = arith.constant 0 : index
      %c0_12 = arith.constant 0 : index
      %14 = vector.load %arg12[%c0_11, %c0_12] : memref<16x128xf32, #tpu.memory_space<vmem>>, vector<16x128xf32>
      tpu.vector_store %arg12[%c0_11, %c0_12], %13 {strides = array<i32>} : memref<16x128xf32, #tpu.memory_space<vmem>>, vector<16x128xf32>,
    } else {
    }
    %c0 = arith.constant 0 : index
    %c0_1 = arith.constant 0 : index
    %3 = vector.load %arg12[%c0, %c0_1] : memref<16x128xf32, #tpu.memory_space<vmem>>, vector<16x128xf32>
    %c0_2 = arith.constant 0 : index
    %c0_3 = arith.constant 0 : index
    %4 = vector.load %arg2[%c0_2, %c0_3] : memref<16x1024xf32, #tpu.memory_space<vmem>>, vector<16x1024xf32>
    %5 = arith.truncf %4 : vector<16x1024xf32> to vector<16x1024xbf16>
    %c0_4 = arith.constant 0 : index
    %c0_5 = arith.constant 0 : index
    %6 = vector.load %arg3[%c0_4, %c0_5] : memref<1024x128xbf16, #tpu.memory_space<vmem>>, vector<1024x128xbf16>
    %cst = arith.constant dense<0.000000e+00> : vector<16x128xf32>
    %7 = tpu.matmul %5, %6, %cst {dimension_numbers = #tpu.dot_dimension_numbers<[1], [0], [0], [1], [0, 0, 1, 1], [], []>} : vector<16x1024xbf16>, vector<1024x128xbf16>, vector<16x128xf32> -> vector<16x128xf32>
    %8 = arith.addf %3, %7 : vector<16x128xf32>
    %c0_6 = arith.constant 0 : index
    %c0_7 = arith.constant 0 : index
    %9 = vector.load %arg12[%c0_6, %c0_7] : memref<16x128xf32, #tpu.memory_space<vmem>>, vector<16x128xf32>
    tpu.vector_store %arg12[%c0_6, %c0_7], %8 {strides = array<i32>} : memref<16x128xf32, #tpu.memory_space<vmem>>, vector<16x128xf32>,
    %c0_i32_8 = arith.constant 0 : i32
    %10 = arith.cmpi eq, %arg1, %c0_i32_8 : i32
    %11 = arith.extui %10 : i1 to i32
    %c0_i32_9 = arith.constant 0 : i32
    %12 = arith.cmpi ne, %11, %c0_i32_9 : i32
    scf.if %12 {
      %c0_10 = arith.constant 0 : index
      %c0_11 = arith.constant 0 : index
      %13 = vector.load %arg12[%c0_10, %c0_11] : memref<16x128xf32, #tpu.memory_space<vmem>>, vector<16x128xf32>
      %c0_12 = arith.constant 0 : index
      %c0_13 = arith.constant 0 : index
      %14 = vector.load %arg4[%c0_12, %c0_13] : memref<1x128xf32, #tpu.memory_space<vmem>>, vector<1x128xf32>
      %15 = vector.broadcast %14 : vector<1x128xf32> to vector<16x128xf32>
      %16 = arith.addf %13, %15 : vector<16x128xf32>
      %cst_14 = arith.constant 0.000000e+00 : f32
      %17 = vector.broadcast %cst_14 : f32 to vector<16x128xf32>
      %18 = arith.maximumf %16, %17 : vector<16x128xf32>
      %19 = arith.truncf %18 : vector<16x128xf32> to vector<16x128xbf16>
      %c0_15 = arith.constant 0 : index
      %c0_16 = arith.constant 0 : index
      %20 = vector.load %arg5[%c0_15, %c0_16] : memref<128x128xbf16, #tpu.memory_space<vmem>>, vector<128x128xbf16>
      %cst_17 = arith.constant dense<0.000000e+00> : vector<16x128xf32>
      %21 = tpu.matmul %19, %20, %cst_17 {dimension_numbers = #tpu.dot_dimension_numbers<[1], [0], [0], [1], [0, 0, 1, 1], [], []>} : vector<16x128xbf16>, vector<128x128xbf16>, vector<16x128xf32> -> vector<16x128xf32>
      %c0_18 = arith.constant 0 : index
      %c0_19 = arith.constant 0 : index
      %22 = vector.load %arg6[%c0_18, %c0_19] : memref<1x128xf32, #tpu.memory_space<vmem>>, vector<1x128xf32>
      %23 = vector.broadcast %22 : vector<1x128xf32> to vector<16x128xf32>
      %24 = arith.addf %21, %23 : vector<16x128xf32>
      %25 = arith.truncf %24 : vector<16x128xf32> to vector<16x128xbf16>
      %c0_20 = arith.constant 0 : index
      %c0_21 = arith.constant 0 : index
      %26 = vector.load %arg7[%c0_20, %c0_21] : memref<128x128xbf16, #tpu.memory_space<vmem>>, vector<128x128xbf16>
      %cst_22 = arith.constant dense<0.000000e+00> : vector<16x128xf32>
      %27 = tpu.matmul %25, %26, %cst_22 {dimension_numbers = #tpu.dot_dimension_numbers<[1], [0], [0], [1], [0, 0, 1, 1], [], []>} : vector<16x128xbf16>, vector<128x128xbf16>, vector<16x128xf32> -> vector<16x128xf32>
      %c0_23 = arith.constant 0 : index
      %c0_24 = arith.constant 0 : index
      %28 = vector.load %arg8[%c0_23, %c0_24] : memref<1x128xf32, #tpu.memory_space<vmem>>, vector<1x128xf32>
      %29 = vector.broadcast %28 : vector<1x128xf32> to vector<16x128xf32>
      %30 = arith.addf %27, %29 : vector<16x128xf32>
      %cst_25 = arith.constant 0.000000e+00 : f32
      %31 = vector.broadcast %cst_25 : f32 to vector<16x128xf32>
      %32 = arith.maximumf %30, %31 : vector<16x128xf32>
      %33 = arith.truncf %32 : vector<16x128xf32> to vector<16x128xbf16>
      %c0_26 = arith.constant 0 : index
      %c0_27 = arith.constant 0 : index
      %34 = vector.load %arg9[%c0_26, %c0_27] : memref<128x128xbf16, #tpu.memory_space<vmem>>, vector<128x128xbf16>
      %cst_28 = arith.constant dense<0.000000e+00> : vector<16x128xf32>
      %35 = tpu.matmul %33, %34, %cst_28 {dimension_numbers = #tpu.dot_dimension_numbers<[1], [0], [0], [1], [0, 0, 1, 1], [], []>} : vector<16x128xbf16>, vector<128x128xbf16>, vector<16x128xf32> -> vector<16x128xf32>
      %c0_29 = arith.constant 0 : index
      %c0_30 = arith.constant 0 : index
      %36 = vector.load %arg10[%c0_29, %c0_30] : memref<1x128xf32, #tpu.memory_space<vmem>>, vector<1x128xf32>
      %37 = vector.broadcast %36 : vector<1x128xf32> to vector<16x128xf32>
      %38 = arith.addf %35, %37 : vector<16x128xf32>
      %39 = arith.truncf %38 : vector<16x128xf32> to vector<16x128xbf16>
      %c0_31 = arith.constant 0 : index
      %c0_32 = arith.constant 0 : index
      %40 = vector.load %arg11[%c0_31, %c0_32] : memref<16x128xbf16, #tpu.memory_space<vmem>>, vector<16x128xbf16>
      tpu.vector_store %arg11[%c0_31, %c0_32], %39 {strides = array<i32>} : memref<16x128xbf16, #tpu.memory_space<vmem>>, vector<16x128xbf16>,
    } else {
    }
    return
  }
  func.func @transform_0(%arg0: i32, %arg1: i32) -> (i32, i32) {
    %c0_i32 = arith.constant 0 : i32
    return %arg0, %arg1 : i32, i32
  }
  func.func @transform_1(%arg0: i32, %arg1: i32) -> (i32, i32) {
    %c0_i32 = arith.constant 0 : i32
    %c0_i32_0 = arith.constant 0 : i32
    return %arg1, %c0_i32 : i32, i32
  }
  func.func @transform_2(%arg0: i32, %arg1: i32) -> (i32, i32) {
    %c0_i32 = arith.constant 0 : i32
    %c0_i32_0 = arith.constant 0 : i32
    %c0_i32_1 = arith.constant 0 : i32
    return %c0_i32, %c0_i32_0 : i32, i32
  }
  func.func @transform_3(%arg0: i32, %arg1: i32) -> (i32, i32) {
    %c0_i32 = arith.constant 0 : i32
    %c0_i32_0 = arith.constant 0 : i32
    %c0_i32_1 = arith.constant 0 : i32
    return %c0_i32, %c0_i32_0 : i32, i32
  }
  func.func @transform_4(%arg0: i32, %arg1: i32) -> (i32, i32) {
    %c0_i32 = arith.constant 0 : i32
    %c0_i32_0 = arith.constant 0 : i32
    %c0_i32_1 = arith.constant 0 : i32
    return %c0_i32, %c0_i32_0 : i32, i32
  }
  func.func @transform_5(%arg0: i32, %arg1: i32) -> (i32, i32) {
    %c0_i32 = arith.constant 0 : i32
    %c0_i32_0 = arith.constant 0 : i32
    %c0_i32_1 = arith.constant 0 : i32
    return %c0_i32, %c0_i32_0 : i32, i32
  }
  func.func @transform_6(%arg0: i32, %arg1: i32) -> (i32, i32) {
    %c0_i32 = arith.constant 0 : i32
    %c0_i32_0 = arith.constant 0 : i32
    %c0_i32_1 = arith.constant 0 : i32
    return %c0_i32, %c0_i32_0 : i32, i32
  }
  func.func @transform_7(%arg0: i32, %arg1: i32) -> (i32, i32) {
    %c0_i32 = arith.constant 0 : i32
    %c0_i32_0 = arith.constant 0 : i32
    %c0_i32_1 = arith.constant 0 : i32
    return %c0_i32, %c0_i32_0 : i32, i32
  }
  func.func @transform_8(%arg0: i32, %arg1: i32) -> (i32, i32) {
    %c0_i32 = arith.constant 0 : i32
    %c0_i32_0 = arith.constant 0 : i32
    %c0_i32_1 = arith.constant 0 : i32
    return %c0_i32, %c0_i32_0 : i32, i32
  }
  func.func @transform_9(%arg0: i32, %arg1: i32) -> (i32, i32) {
    %c0_i32 = arith.constant 0 : i32
    %c0_i32_0 = arith.constant 0 : i32
    return %arg0, %c0_i32 : i32, i32
  }
}

module attributes {stable_mosaic.version = 11 : i64} {
  func.func @simclr_kernel(%arg0: i32, %arg1: i32, %arg2: memref<16x1024xf32, #tpu.memory_space<vmem>>, %arg3: memref<1024x128xbf16, #tpu.memory_space<vmem>>, %arg4: memref<1x128xf32, #tpu.memory_space<vmem>>, %arg5: memref<128x128xbf16, #tpu.memory_space<vmem>>, %arg6: memref<1x128xf32, #tpu.memory_space<vmem>>, %arg7: memref<128x128xbf16, #tpu.memory_space<vmem>>, %arg8: memref<1x128xf32, #tpu.memory_space<vmem>>, %arg9: memref<128x128xbf16, #tpu.memory_space<vmem>>, %arg10: memref<1x128xf32, #tpu.memory_space<vmem>>, %arg11: memref<16x128xbf16, #tpu.memory_space<vmem>>, %arg12: memref<16x128xf32, #tpu.memory_space<vmem>>) attributes {dimension_semantics = [#tpu.dimension_semantics<parallel>, #tpu.dimension_semantics<arbitrary>], iteration_bounds = array<i64: 1, 1>, scalar_prefetch = 0 : i64, scratch_operands = 1 : i64, tpu.core_type = #tpu.core_type<tc>, window_params = [{transform_indices = @transform_0, window_bounds = array<i64: 16, 1024>}, {transform_indices = @transform_1, window_bounds = array<i64: 1024, 128>}, {pipeline_mode = #tpu.pipeline_mode<synchronous>, transform_indices = @transform_2, window_bounds = array<i64: 1, 128>}, {pipeline_mode = #tpu.pipeline_mode<synchronous>, transform_indices = @transform_3, window_bounds = array<i64: 128, 128>}, {pipeline_mode = #tpu.pipeline_mode<synchronous>, transform_indices = @transform_4, window_bounds = array<i64: 1, 128>}, {pipeline_mode = #tpu.pipeline_mode<synchronous>, transform_indices = @transform_5, window_bounds = array<i64: 128, 128>}, {pipeline_mode = #tpu.pipeline_mode<synchronous>, transform_indices = @transform_6, window_bounds = array<i64: 1, 128>}, {pipeline_mode = #tpu.pipeline_mode<synchronous>, transform_indices = @transform_7, window_bounds = array<i64: 128, 128>}, {pipeline_mode = #tpu.pipeline_mode<synchronous>, transform_indices = @transform_8, window_bounds = array<i64: 1, 128>}, {transform_indices = @transform_9, window_bounds = array<i64: 16, 128>}]} {
    %c0_i32 = arith.constant 0 : i32
    %0 = arith.cmpi eq, %arg1, %c0_i32 : i32
    %1 = arith.extui %0 : i1 to i32
    %c0_i32_0 = arith.constant 0 : i32
    %2 = arith.cmpi ne, %1, %c0_i32_0 : i32
    scf.if %2 {
      %cst_10 = arith.constant 0.000000e+00 : f32
      %13 = vector.broadcast %cst_10 : f32 to vector<16x128xf32>
      %c0_11 = arith.constant 0 : index
      %c0_12 = arith.constant 0 : index
      %14 = vector.load %arg12[%c0_11, %c0_12] : memref<16x128xf32, #tpu.memory_space<vmem>>, vector<16x128xf32>
      tpu.vector_store %arg12[%c0_11, %c0_12], %13 {strides = array<i32>} : memref<16x128xf32, #tpu.memory_space<vmem>>, vector<16x128xf32>,
    } else {
    }
    %c0 = arith.constant 0 : index
    %c0_1 = arith.constant 0 : index
    %3 = vector.load %arg12[%c0, %c0_1] : memref<16x128xf32, #tpu.memory_space<vmem>>, vector<16x128xf32>
    %c0_2 = arith.constant 0 : index
    %c0_3 = arith.constant 0 : index
    %4 = vector.load %arg2[%c0_2, %c0_3] : memref<16x1024xf32, #tpu.memory_space<vmem>>, vector<16x1024xf32>
    %5 = arith.truncf %4 : vector<16x1024xf32> to vector<16x1024xbf16>
    %c0_4 = arith.constant 0 : index
    %c0_5 = arith.constant 0 : index
    %6 = vector.load %arg3[%c0_4, %c0_5] : memref<1024x128xbf16, #tpu.memory_space<vmem>>, vector<1024x128xbf16>
    %cst = arith.constant dense<0.000000e+00> : vector<16x128xf32>
    %7 = tpu.matmul %5, %6, %cst {dimension_numbers = #tpu.dot_dimension_numbers<[1], [0], [0], [1], [0, 0, 1, 1], [], []>} : vector<16x1024xbf16>, vector<1024x128xbf16>, vector<16x128xf32> -> vector<16x128xf32>
    %8 = arith.addf %3, %7 : vector<16x128xf32>
    %c0_6 = arith.constant 0 : index
    %c0_7 = arith.constant 0 : index
    %9 = vector.load %arg12[%c0_6, %c0_7] : memref<16x128xf32, #tpu.memory_space<vmem>>, vector<16x128xf32>
    tpu.vector_store %arg12[%c0_6, %c0_7], %8 {strides = array<i32>} : memref<16x128xf32, #tpu.memory_space<vmem>>, vector<16x128xf32>,
    %c0_i32_8 = arith.constant 0 : i32
    %10 = arith.cmpi eq, %arg1, %c0_i32_8 : i32
    %11 = arith.extui %10 : i1 to i32
    %c0_i32_9 = arith.constant 0 : i32
    %12 = arith.cmpi ne, %11, %c0_i32_9 : i32
    scf.if %12 {
      %c0_10 = arith.constant 0 : index
      %c0_11 = arith.constant 0 : index
      %13 = vector.load %arg12[%c0_10, %c0_11] : memref<16x128xf32, #tpu.memory_space<vmem>>, vector<16x128xf32>
      %c0_12 = arith.constant 0 : index
      %c0_13 = arith.constant 0 : index
      %14 = vector.load %arg4[%c0_12, %c0_13] : memref<1x128xf32, #tpu.memory_space<vmem>>, vector<1x128xf32>
      %15 = vector.broadcast %14 : vector<1x128xf32> to vector<16x128xf32>
      %16 = arith.addf %13, %15 : vector<16x128xf32>
      %cst_14 = arith.constant 0.000000e+00 : f32
      %17 = vector.broadcast %cst_14 : f32 to vector<16x128xf32>
      %18 = arith.maximumf %16, %17 : vector<16x128xf32>
      %19 = arith.truncf %18 : vector<16x128xf32> to vector<16x128xbf16>
      %c0_15 = arith.constant 0 : index
      %c0_16 = arith.constant 0 : index
      %20 = vector.load %arg5[%c0_15, %c0_16] : memref<128x128xbf16, #tpu.memory_space<vmem>>, vector<128x128xbf16>
      %cst_17 = arith.constant dense<0.000000e+00> : vector<16x128xf32>
      %21 = tpu.matmul %19, %20, %cst_17 {dimension_numbers = #tpu.dot_dimension_numbers<[1], [0], [0], [1], [0, 0, 1, 1], [], []>} : vector<16x128xbf16>, vector<128x128xbf16>, vector<16x128xf32> -> vector<16x128xf32>
      %c0_18 = arith.constant 0 : index
      %c0_19 = arith.constant 0 : index
      %22 = vector.load %arg6[%c0_18, %c0_19] : memref<1x128xf32, #tpu.memory_space<vmem>>, vector<1x128xf32>
      %23 = vector.broadcast %22 : vector<1x128xf32> to vector<16x128xf32>
      %24 = arith.addf %21, %23 : vector<16x128xf32>
      %25 = arith.truncf %24 : vector<16x128xf32> to vector<16x128xbf16>
      %c0_20 = arith.constant 0 : index
      %c0_21 = arith.constant 0 : index
      %26 = vector.load %arg7[%c0_20, %c0_21] : memref<128x128xbf16, #tpu.memory_space<vmem>>, vector<128x128xbf16>
      %cst_22 = arith.constant dense<0.000000e+00> : vector<16x128xf32>
      %27 = tpu.matmul %25, %26, %cst_22 {dimension_numbers = #tpu.dot_dimension_numbers<[1], [0], [0], [1], [0, 0, 1, 1], [], []>} : vector<16x128xbf16>, vector<128x128xbf16>, vector<16x128xf32> -> vector<16x128xf32>
      %c0_23 = arith.constant 0 : index
      %c0_24 = arith.constant 0 : index
      %28 = vector.load %arg8[%c0_23, %c0_24] : memref<1x128xf32, #tpu.memory_space<vmem>>, vector<1x128xf32>
      %29 = vector.broadcast %28 : vector<1x128xf32> to vector<16x128xf32>
      %30 = arith.addf %27, %29 : vector<16x128xf32>
      %cst_25 = arith.constant 0.000000e+00 : f32
      %31 = vector.broadcast %cst_25 : f32 to vector<16x128xf32>
      %32 = arith.maximumf %30, %31 : vector<16x128xf32>
      %33 = arith.truncf %32 : vector<16x128xf32> to vector<16x128xbf16>
      %c0_26 = arith.constant 0 : index
      %c0_27 = arith.constant 0 : index
      %34 = vector.load %arg9[%c0_26, %c0_27] : memref<128x128xbf16, #tpu.memory_space<vmem>>, vector<128x128xbf16>
      %cst_28 = arith.constant dense<0.000000e+00> : vector<16x128xf32>
      %35 = tpu.matmul %33, %34, %cst_28 {dimension_numbers = #tpu.dot_dimension_numbers<[1], [0], [0], [1], [0, 0, 1, 1], [], []>} : vector<16x128xbf16>, vector<128x128xbf16>, vector<16x128xf32> -> vector<16x128xf32>
      %c0_29 = arith.constant 0 : index
      %c0_30 = arith.constant 0 : index
      %36 = vector.load %arg10[%c0_29, %c0_30] : memref<1x128xf32, #tpu.memory_space<vmem>>, vector<1x128xf32>
      %37 = vector.broadcast %36 : vector<1x128xf32> to vector<16x128xf32>
      %38 = arith.addf %35, %37 : vector<16x128xf32>
      %39 = arith.truncf %38 : vector<16x128xf32> to vector<16x128xbf16>
      %c0_31 = arith.constant 0 : index
      %c0_32 = arith.constant 0 : index
      %40 = vector.load %arg11[%c0_31, %c0_32] : memref<16x128xbf16, #tpu.memory_space<vmem>>, vector<16x128xbf16>
      tpu.vector_store %arg11[%c0_31, %c0_32], %39 {strides = array<i32>} : memref<16x128xbf16, #tpu.memory_space<vmem>>, vector<16x128xbf16>,
    } else {
    }
    return
  }
  func.func @transform_0(%arg0: i32, %arg1: i32) -> (i32, i32) {
    %c0_i32 = arith.constant 0 : i32
    return %arg0, %arg1 : i32, i32
  }
  func.func @transform_1(%arg0: i32, %arg1: i32) -> (i32, i32) {
    %c0_i32 = arith.constant 0 : i32
    %c0_i32_0 = arith.constant 0 : i32
    return %arg1, %c0_i32 : i32, i32
  }
  func.func @transform_2(%arg0: i32, %arg1: i32) -> (i32, i32) {
    %c0_i32 = arith.constant 0 : i32
    %c0_i32_0 = arith.constant 0 : i32
    %c0_i32_1 = arith.constant 0 : i32
    return %c0_i32, %c0_i32_0 : i32, i32
  }
  func.func @transform_3(%arg0: i32, %arg1: i32) -> (i32, i32) {
    %c0_i32 = arith.constant 0 : i32
    %c0_i32_0 = arith.constant 0 : i32
    %c0_i32_1 = arith.constant 0 : i32
    return %c0_i32, %c0_i32_0 : i32, i32
  }
  func.func @transform_4(%arg0: i32, %arg1: i32) -> (i32, i32) {
    %c0_i32 = arith.constant 0 : i32
    %c0_i32_0 = arith.constant 0 : i32
    %c0_i32_1 = arith.constant 0 : i32
    return %c0_i32, %c0_i32_0 : i32, i32
  }
  func.func @transform_5(%arg0: i32, %arg1: i32) -> (i32, i32) {
    %c0_i32 = arith.constant 0 : i32
    %c0_i32_0 = arith.constant 0 : i32
    %c0_i32_1 = arith.constant 0 : i32
    return %c0_i32, %c0_i32_0 : i32, i32
  }
  func.func @transform_6(%arg0: i32, %arg1: i32) -> (i32, i32) {
    %c0_i32 = arith.constant 0 : i32
    %c0_i32_0 = arith.constant 0 : i32
    %c0_i32_1 = arith.constant 0 : i32
    return %c0_i32, %c0_i32_0 : i32, i32
  }
  func.func @transform_7(%arg0: i32, %arg1: i32) -> (i32, i32) {
    %c0_i32 = arith.constant 0 : i32
    %c0_i32_0 = arith.constant 0 : i32
    %c0_i32_1 = arith.constant 0 : i32
    return %c0_i32, %c0_i32_0 : i32, i32
  }
  func.func @transform_8(%arg0: i32, %arg1: i32) -> (i32, i32) {
    %c0_i32 = arith.constant 0 : i32
    %c0_i32_0 = arith.constant 0 : i32
    %c0_i32_1 = arith.constant 0 : i32
    return %c0_i32, %c0_i32_0 : i32, i32
  }
  func.func @transform_9(%arg0: i32, %arg1: i32) -> (i32, i32) {
    %c0_i32 = arith.constant 0 : i32
    %c0_i32_0 = arith.constant 0 : i32
    return %arg0, %c0_i32 : i32, i32
  }
}

</mosaic_0001>

<bundles_post_ra>
// kernel: tpu_custom_call.1
= control target key start
LH: loop header
LB: loop body
LE: loop exit
PB: predicated region body
PF: predicated region fallthrough
CT: control target
= control target key end

     0   :  { %14 = vsyncpa [#allocation4], 0  ;;  %s1913_s0 = inlined_call_operand.hbm [shape: f32[16,1024], index: 0, kind: input, shape index: {}]   ;;  %s1914_s1 = inlined_call_operand.hbm [shape: bf16[1024,128], index: 1, kind: input, shape index: {}]   ;;  %s1915_s2 = inlined_call_operand.vmem [shape: f32[1,128], index: 2, kind: input, shape index: {}]   ;;  %s1916_s3 = inlined_call_operand.hbm [shape: bf16[128,128], index: 3, kind: input, shape index: {}]   ;;  %s1917_s4 = inlined_call_operand.vmem [shape: f32[1,128], index: 4, kind: input, shape index: {}]   ;;  %s1918_s5 = inlined_call_operand.hbm [shape: bf16[128,128], index: 5, kind: input, shape index: {}]   ;;  %s1919_s6 = inlined_call_operand.vmem [shape: f32[1,128], index: 6, kind: input, shape index: {}]   ;;  %s1920_s7 = inlined_call_operand.hbm [shape: bf16[128,128], index: 7, kind: input, shape index: {}]   ;;  %s1921_s8 = inlined_call_operand.vmem [shape: f32[1,128], index: 8, kind: input, shape index: {}]   ;;  %s1922_s9 = inlined_call_operand.hbm [shape: bf16[16,128], index: 9, kind: output, shape index: {}]  }
   0x1   :  { %15 = vsyncpa [#allocation7], 0 }
   0x2   :  { %16 = vsyncpa [#allocation10], 0 }
   0x3   :  { %17 = vsyncpa [#allocation5], 0  ;;  %s1715_s30 = smov [#allocation6]   ;;  %s1575_s13 = scalar_lea.hbm %s1914_s1, 8192 }
   0x4   :  { %s35_s10 = sshll.u32 %s1715_s30, 4  ;;  %p1576_p0 = scmp.ne.s32.totalorder %s1914_s1, %s1575_s13  ;;  %s36_s10 = int_to_ptr.vmem [resolvable:$true] %s35_s10 }
   0x5   :  { %p1579_p1 = scmp.lt.u32.totalorder %s1575_s13, %s1914_s1 }
   0x7   :  { %p1581_p2 = pnand %p1579_p1, %p1576_p0 }
   0x9   :  { %1584 = shalt.err (!%p1581_p2)
}
   0xa   :  { %s1585_s18 = scalar_lea.vmem %s36_s10, 8192  ;;  %p1590_p4 = scmp.lt.s32.totalorder %s36_s10, %s36_s10 }
   0xb   :  { %p1586_p3 = scmp.ne.s32.totalorder %s36_s10, %s1585_s18  ;;  %p1591_p5 = scmp.lt.s32.totalorder %s1585_s18, %s1585_s18 }
   0xd   :  { %p1592_p6 = por %p1591_p5, %p1590_p4 }
   0xf   :  { %p1593_p7 = pnand %p1592_p6, %p1586_p3 }
  0x11   :  { %1596 = shalt.err (!%p1593_p7)
}
  0x12   :  { %s1716_s19 = smov 64   ;;  %s1717_s20 = smov 4  }
  0x13   :  { %41 = dma.hbm_to_vmem [thread:$0]  %s1914_s1, 8192, %s36_s10, [#allocation7], %s1716_s19, %s1716_s19, %s1717_s20  }
  0x14   :  { %s1718_s23 = smov [#allocation9]   ;;  %s1719_s25 = smov [#allocation3]  }
  0x15   :  { %s63_s24 = sshll.u32 %s1718_s23, 4  ;;  %s23_s26 = sshll.u32 %s1719_s25, 4  ;;  %s64_s24 = int_to_ptr.vmem [resolvable:$true] %s63_s24  ;;  %s24_s26 = int_to_ptr.vmem [resolvable:$true] %s23_s26 }
  0x16   :  { %s1597_s29 = scalar_lea.hbm %s1918_s5, 1024 }
  0x17   :  { %p1598_p8 = scmp.ne.s32.totalorder %s1918_s5, %s1597_s29  ;;  %p1601_p9 = scmp.lt.u32.totalorder %s1597_s29, %s1918_s5 }
  0x19   :  { %p1603_p10 = pnand %p1601_p9, %p1598_p8 }
  0x1b   :  { %1606 = shalt.err (!%p1603_p10)
}
  0x1c   :  { %s1607_s1 = scalar_lea.vmem %s64_s24, 1024  ;;  %p1612_p12 = scmp.lt.s32.totalorder %s64_s24, %s64_s24 }
  0x1d   :  { %p1608_p11 = scmp.ne.s32.totalorder %s64_s24, %s1607_s1  ;;  %p1613_p13 = scmp.lt.s32.totalorder %s1607_s1, %s1607_s1 }
  0x1f   :  { %p1614_p0 = por %p1613_p13, %p1612_p12 }
  0x21   :  { %p1615_p1 = pnand %p1614_p0, %p1608_p11 }
  0x23   :  { %1618 = shalt.err (!%p1615_p1)
}
  0x24   :  { %69 = dma.hbm_to_vmem [thread:$0]  %s1918_s5, 1024, %s64_s24, [#allocation10], %s1716_s19, %s1716_s19, %s1717_s20  }
  0x25   :  { %s1619_s17 = scalar_lea.hbm %s1913_s0, 2048 }
  0x26   :  { %p1620_p2 = scmp.ne.s32.totalorder %s1913_s0, %s1619_s17  ;;  %p1623_p3 = scmp.lt.u32.totalorder %s1619_s17, %s1913_s0 }
  0x28   :  { %p1625_p4 = pnand %p1623_p3, %p1620_p2 }
  0x2a   :  { %1628 = shalt.err (!%p1625_p4)
}
  0x2b   :  { %s1629_s25 = scalar_lea.vmem %s24_s26, 2048  ;;  %p1634_p6 = scmp.lt.s32.totalorder %s24_s26, %s24_s26 }
  0x2c   :  { %p1630_p5 = scmp.ne.s32.totalorder %s24_s26, %s1629_s25  ;;  %p1635_p7 = scmp.lt.s32.totalorder %s1629_s25, %s1629_s25 }
  0x2e   :  { %p1636_p8 = por %p1635_p7, %p1634_p6 }
  0x30   :  { %p1637_p9 = pnand %p1636_p8, %p1630_p5 }
  0x32   :  { %1640 = shalt.err (!%p1637_p9)
}
  0x33   :  { %s1720_s5 = smov 1024   ;;  %s1721_s28 = smov [#allocation8]  }
  0x34   :  { %29 = dma.hbm_to_vmem [thread:$0]  %s1913_s0, 2048, %s24_s26, [#allocation4], %s1720_s5, %s1720_s5, %s1716_s19  }
  0x35   :  { %s49_s29 = sshll.u32 %s1721_s28, 4  ;;  %s1722_s30 = smov [#allocation11]   ;;  %s50_s29 = int_to_ptr.vmem [resolvable:$true] %s49_s29 }
  0x36   :  { %s77_s11 = sshll.u32 %s1722_s30, 4  ;;  %s1641_s1 = scalar_lea.hbm %s1916_s3, 1024  ;;  %s1819_s11 = int_to_ptr.vmem [resolvable:$true] %s77_s11 }
  0x37   :  { %p1642_p10 = scmp.ne.s32.totalorder %s1916_s3, %s1641_s1  ;;  %p1645_p11 = scmp.lt.u32.totalorder %s1641_s1, %s1916_s3 }
  0x39   :  { %p1647_p12 = pnand %p1645_p11, %p1642_p10 }
  0x3b   :  { %1650 = shalt.err (!%p1647_p12)
}
  0x3c   :  { %s1651_s0 = scalar_lea.vmem %s50_s29, 1024  ;;  %p1656_p0 = scmp.lt.s32.totalorder %s50_s29, %s50_s29 }
  0x3d   :  { %p1652_p13 = scmp.ne.s32.totalorder %s50_s29, %s1651_s0  ;;  %p1657_p1 = scmp.lt.s32.totalorder %s1651_s0, %s1651_s0 }
  0x3f   :  { %p1658_p2 = por %p1657_p1, %p1656_p0 }
  0x41   :  { %p1659_p3 = pnand %p1658_p2, %p1652_p13 }
  0x43   :  { %1662 = shalt.err (!%p1659_p3)
}
  0x44   :  { %55 = dma.hbm_to_vmem [thread:$0]  %s1916_s3, 1024, %s50_s29, [#allocation7], %s1716_s19, %s1716_s19, %s1717_s20  }
  0x45   :  { %s1663_s22 = scalar_lea.hbm %s1920_s7, 1024 }
  0x46   :  { %p1664_p4 = scmp.ne.s32.totalorder %s1920_s7, %s1663_s22  ;;  %p1667_p5 = scmp.lt.u32.totalorder %s1663_s22, %s1920_s7 }
  0x48   :  { %p1669_p6 = pnand %p1667_p5, %p1664_p4 }
  0x4a   :  { %1672 = shalt.err (!%p1669_p6)
}
  0x4b   :  { %s1673_s27 = scalar_lea.vmem %s1819_s11, 1024  ;;  %p1678_p8 = scmp.lt.s32.totalorder %s1819_s11, %s1819_s11 }
  0x4c   :  { %p1674_p7 = scmp.ne.s32.totalorder %s1819_s11, %s1673_s27  ;;  %p1679_p9 = scmp.lt.s32.totalorder %s1673_s27, %s1673_s27 }
  0x4e   :  { %p1680_p10 = por %p1679_p9, %p1678_p8 }
  0x50   :  { %p1681_p11 = pnand %p1680_p10, %p1674_p7 }
  0x52   :  { %1684 = shalt.err (!%p1681_p11)
}
  0x53   :  { %83 = dma.hbm_to_vmem [thread:$0]  %s1920_s7, 1024, %s1819_s11, [#allocation10], %s1716_s19, %s1716_s19, %s1717_s20  }
  0x54   :  { %1707 = dma.done.wait [#allocation4], 2048  }
  0x55   :  { %1708 = vsyncadd [#allocation4], 4294965248 }
  0x56   :  { %1709 = dma.done.wait [#allocation7], 9216  }
  0x57   :  { %1710 = vsyncadd [#allocation7], 4294958080 }
  0x58   :  { %1711 = dma.done.wait [#allocation10], 2048  }
  0x59   :  { %1712 = vsyncadd [#allocation10], 4294965248  ;;  %v1487_v0 = vld [vmem:[#allocation6 + $0x40] sm:$0xff]   ;;  %v1491_v4 = vld [vmem:[#allocation6 + $0x48] sm:$0xff]   ;;  %vm1724_vm0 = vmmov 0   ;;  %s1725_s1 = smov [#allocation12]  }
  0x5a   :  { %v1488_v1 = vld [vmem:[#allocation6 + $0xc0] sm:$0xff]   ;;  %1301 = vmatprep.subr.bf16.mxu0 %v1487_v0  ;;  %v1492_v5 = vld [vmem:[#allocation6 + $0xc8] sm:$0xff]   ;;  %v1495_v8 = vld [vmem:[#allocation6 + $0x50] sm:$0xff]   ;;  %s1186_s10 = sshll.u32 %s1725_s1, 4  ;;  %s1187_s10 = int_to_ptr.vmem [resolvable:$true] %s1186_s10 }
  0x5b   :  { %v1489_v2 = vld [vmem:[#allocation6] sm:$0xff]   ;;  %1323 = vmatprep.subr.bf16.mxu1 %v1488_v1  ;;  %v1493_v6 = vld [vmem:[#allocation6 + $0x8] sm:$0xff]   ;;  %v1496_v9 = vld [vmem:[#allocation6 + $0xd0] sm:$0xff]   ;;  %p1690_p13 = scmp.lt.s32.totalorder %s1187_s10, %s1187_s10 }
  0x5c   :  { %v1490_v3 = vld [vmem:[#allocation6 + $0x80] sm:$0xff]   ;;  %1302 = vmatpush3.bf16.msra.mxu0 %v1489_v2  ;;  %v1494_v7 = vld [vmem:[#allocation6 + $0x88] sm:$0xff]   ;;  %v1497_v10 = vld [vmem:[#allocation6 + $0x10] sm:$0xff]  }
  0x5d   :  { %1324 = vmatpush3.bf16.msra.mxu1 %v1490_v3  ;;  %1303 = vmatprep.subr.bf16.mxu0 %v1491_v4  ;;  %v1498_v11 = vld [vmem:[#allocation6 + $0x90] sm:$0xff]   ;;  %v1499_v12 = vld [vmem:[#allocation6 + $0x58] sm:$0xff]   ;;  %v1503_v16 = vld [vmem:[#allocation6 + $0x60] sm:$0xff]  }
  0x5e   :  { %1325 = vmatprep.subr.bf16.mxu1 %v1492_v5  ;;  %v1500_v13 = vld [vmem:[#allocation6 + $0xd8] sm:$0xff]   ;;  %v1504_v17 = vld [vmem:[#allocation6 + $0xe0] sm:$0xff]   ;;  %v1507_v20 = vld [vmem:[#allocation6 + $0x68] sm:$0xff]  }
  0x5f   :  { %v1501_v14 = vld [vmem:[#allocation6 + $0x18] sm:$0xff]   ;;  %v1505_v18 = vld [vmem:[#allocation6 + $0x20] sm:$0xff]   ;;  %v1508_v21 = vld [vmem:[#allocation6 + $0xe8] sm:$0xff]  }
  0x60   :  { %1304 = vmatpush3.bf16.msra.mxu0 %v1493_v6  ;;  %v1502_v15 = vld [vmem:[#allocation6 + $0x98] sm:$0xff]   ;;  %v1506_v19 = vld [vmem:[#allocation6 + $0xa0] sm:$0xff]   ;;  %v1509_v22 = vld [vmem:[#allocation6 + $0x28] sm:$0xff]  }
  0x61   :  { %1326 = vmatpush3.bf16.msra.mxu1 %v1494_v7  ;;  %1305 = vmatprep.subr.bf16.mxu0 %v1495_v8  ;;  %v1510_v23 = vld [vmem:[#allocation6 + $0xa8] sm:$0xff]   ;;  %v1511_v24 = vld [vmem:[#allocation6 + $0x70] sm:$0xff]   ;;  %v1515_v28 = vld [vmem:[#allocation6 + $0x78] sm:$0xff]  }
  0x62   :  { %1327 = vmatprep.subr.bf16.mxu1 %v1496_v9  ;;  %v1512_v25 = vld [vmem:[#allocation6 + $0xf0] sm:$0xff]   ;;  %v1516_v29 = vld [vmem:[#allocation6 + $0xf8] sm:$0xff]   ;;  %v111_v32 = vld [vmem:[#allocation3 + $0x8] sm:$0xff] }
  0x63   :  { %v1513_v26 = vld [vmem:[#allocation6 + $0x30] sm:$0xff]   ;;  %v1517_v30 = vld [vmem:[#allocation6 + $0x38] sm:$0xff]   ;;  %v119_v33 = vld [vmem:[#allocation3 + $0x48] sm:$0xff] }
  0x64   :  { %1306 = vmatpush3.bf16.msra.mxu0 %v1497_v10  ;;  %v1514_v27 = vld [vmem:[#allocation6 + $0xb0] sm:$0xff]   ;;  %v1518_v31 = vld [vmem:[#allocation6 + $0xb8] sm:$0xff]   ;;  %v127_v35 = vpack.c.bf16 %v119_v33, %v111_v32  ;;  %v110_v37 = vld [vmem:[#allocation3] sm:$0xff] }
  0x65   :  { %1328 = vmatpush3.bf16.msra.mxu1 %v1498_v11  ;;  %1307 = vmatprep.subr.bf16.mxu0 %v1499_v12  ;;  %v113_v34 = vld [vmem:[#allocation3 + $0x18] sm:$0xff]  ;;  %v118_v38 = vld [vmem:[#allocation3 + $0x40] sm:$0xff]  ;;  %v112_v41 = vld [vmem:[#allocation3 + $0x10] sm:$0xff] }
  0x66   :  { %1329 = vmatprep.subr.bf16.mxu1 %v1500_v13  ;;  %v121_v36 = vld [vmem:[#allocation3 + $0x58] sm:$0xff]  ;;  %v126_v40 = vpack.c.bf16 %v118_v38, %v110_v37  ;;  %v120_v42 = vld [vmem:[#allocation3 + $0x50] sm:$0xff]  ;;  %678 = vmatprep.mubr.bf16.mxu0 %v127_v35  ;;  %v1519_v44 = vld [vmem:[#allocation6 + $0x140] sm:$0xff]  }
  0x67   :  { %v129_v39 = vpack.c.bf16 %v121_v36, %v113_v34  ;;  %v128_v43 = vpack.c.bf16 %v120_v42, %v112_v41  ;;  %v1520_v45 = vld [vmem:[#allocation6 + $0x1c0] sm:$0xff]   ;;  %v1523_v48 = vld [vmem:[#allocation6 + $0x148] sm:$0xff]   ;;  %v1527_v52 = vld [vmem:[#allocation6 + $0x150] sm:$0xff]  }
  0x68   :  { %1308 = vmatpush3.bf16.msra.mxu0 %v1501_v14  ;;  %v1521_v46 = vld [vmem:[#allocation6 + $0x100] sm:$0xff]   ;;  %v1524_v49 = vld [vmem:[#allocation6 + $0x1c8] sm:$0xff]   ;;  %v1528_v53 = vld [vmem:[#allocation6 + $0x1d0] sm:$0xff]  }
  0x69   :  { %1330 = vmatpush3.bf16.msra.mxu1 %v1502_v15  ;;  %1309 = vmatprep.subr.bf16.mxu0 %v1503_v16  ;;  %v1522_v47 = vld [vmem:[#allocation6 + $0x180] sm:$0xff]   ;;  %v1525_v50 = vld [vmem:[#allocation6 + $0x108] sm:$0xff]   ;;  %v1529_v54 = vld [vmem:[#allocation6 + $0x110] sm:$0xff]  }
  0x6a   :  { %1331 = vmatprep.subr.bf16.mxu1 %v1504_v17  ;;  %719 = vmatprep.mubr.bf16.mxu1 %v129_v39  ;;  %v1526_v51 = vld [vmem:[#allocation6 + $0x188] sm:$0xff]   ;;  %v1530_v55 = vld [vmem:[#allocation6 + $0x190] sm:$0xff]   ;;  %v1531_v56 = vld [vmem:[#allocation6 + $0x158] sm:$0xff]  }
  0x6b   :  { %v1532_v57 = vld [vmem:[#allocation6 + $0x1d8] sm:$0xff]   ;;  %v1535_v60 = vld [vmem:[#allocation6 + $0x160] sm:$0xff]   ;;  %v1539_v0 = vld [vmem:[#allocation6 + $0x168] sm:$0xff]  }
  0x6c   :  { %1310 = vmatpush3.bf16.msra.mxu0 %v1505_v18  ;;  %v1533_v58 = vld [vmem:[#allocation6 + $0x118] sm:$0xff]   ;;  %v1536_v61 = vld [vmem:[#allocation6 + $0x1e0] sm:$0xff]   ;;  %v1540_v1 = vld [vmem:[#allocation6 + $0x1e8] sm:$0xff]  }
  0x6d   :  { %1332 = vmatpush3.bf16.msra.mxu1 %v1506_v19  ;;  %1311 = vmatprep.subr.bf16.mxu0 %v1507_v20  ;;  %v1534_v59 = vld [vmem:[#allocation6 + $0x198] sm:$0xff]   ;;  %v1537_v62 = vld [vmem:[#allocation6 + $0x120] sm:$0xff]   ;;  %v1541_v2 = vld [vmem:[#allocation6 + $0x128] sm:$0xff]  }
  0x6e   :  { %1333 = vmatprep.subr.bf16.mxu1 %v1508_v21  ;;  %v1538_v63 = vld [vmem:[#allocation6 + $0x1a0] sm:$0xff]   ;;  %v1542_v3 = vld [vmem:[#allocation6 + $0x1a8] sm:$0xff]   ;;  %v1543_v4 = vld [vmem:[#allocation6 + $0x170] sm:$0xff]  }
  0x6f   :  { %v1544_v5 = vld [vmem:[#allocation6 + $0x1f0] sm:$0xff]   ;;  %v1547_v8 = vld [vmem:[#allocation6 + $0x178] sm:$0xff]   ;;  %v115_v12 = vld [vmem:[#allocation3 + $0x28] sm:$0xff] }
  0x70   :  { %1312 = vmatpush3.bf16.msra.mxu0 %v1509_v22  ;;  %v1545_v6 = vld [vmem:[#allocation6 + $0x130] sm:$0xff]   ;;  %v1548_v9 = vld [vmem:[#allocation6 + $0x1f8] sm:$0xff]   ;;  %v123_v13 = vld [vmem:[#allocation3 + $0x68] sm:$0xff] }
  0x71   :  { %1334 = vmatpush3.bf16.msra.mxu1 %v1510_v23  ;;  %1313 = vmatprep.subr.bf16.mxu0 %v1511_v24  ;;  %v1546_v7 = vld [vmem:[#allocation6 + $0x1b0] sm:$0xff]   ;;  %v1549_v10 = vld [vmem:[#allocation6 + $0x138] sm:$0xff]   ;;  %v131_v16 = vpack.c.bf16 %v123_v13, %v115_v12  ;;  %v114_v18 = vld [vmem:[#allocation3 + $0x20] sm:$0xff] }
  0x72   :  { %1335 = vmatprep.subr.bf16.mxu1 %v1512_v25  ;;  %v1550_v11 = vld [vmem:[#allocation6 + $0x1b8] sm:$0xff]   ;;  %v122_v19 = vld [vmem:[#allocation3 + $0x60] sm:$0xff]  ;;  %v116_v20 = vld [vmem:[#allocation3 + $0x30] sm:$0xff]  ;;  %v1723_v25 = vmov 0.0  }
  0x73   :  { %v117_v14 = vld [vmem:[#allocation3 + $0x38] sm:$0xff]  ;;  %v130_v21 = vpack.c.bf16 %v122_v19, %v114_v18  ;;  %v124_v22 = vld [vmem:[#allocation3 + $0x70] sm:$0xff]  ;;  %v1551_v24 = vld [vmem:[#allocation8] sm:$0xff]  }
  0x74   :  { %1314 = vmatpush3.bf16.msra.mxu0 %v1513_v26  ;;  %v125_v15 = vld [vmem:[#allocation3 + $0x78] sm:$0xff]  ;;  %v132_v23 = vpack.c.bf16 %v124_v22, %v116_v20  ;;  %v1552_v26 = vld [vmem:[#allocation8 + $0x8] sm:$0xff]   ;;  %v1559_v33 = vld [vmem:[#allocation9] sm:$0xff]  }
  0x75   :  { %1336 = vmatpush3.bf16.msra.mxu1 %v1514_v27  ;;  %1315 = vmatprep.subr.bf16.mxu0 %v1515_v28  ;;  %v133_v17 = vpack.c.bf16 %v125_v15, %v117_v14  ;;  %v1553_v27 = vld [vmem:[#allocation8 + $0x10] sm:$0xff]   ;;  %v1554_v28 = vld [vmem:[#allocation8 + $0x18] sm:$0xff]   ;;  %v1560_v34 = vld [vmem:[#allocation9 + $0x8] sm:$0xff]  }
  0x76   :  { %1337 = vmatprep.subr.bf16.mxu1 %v1516_v29  ;;  %v1555_v29 = vld [vmem:[#allocation8 + $0x20] sm:$0xff]   ;;  %v1558_v32 = vld [vmem:[#allocation8 + $0x38] sm:$0xff]   ;;  %v1561_v35 = vld [vmem:[#allocation9 + $0x10] sm:$0xff]  }
  0x77   :  { %v1562_v36 = vld [vmem:[#allocation9 + $0x18] sm:$0xff]   ;;  %v1563_v37 = vld [vmem:[#allocation9 + $0x20] sm:$0xff]   ;;  %v1564_v38 = vld [vmem:[#allocation9 + $0x28] sm:$0xff]  }
  0x78   :  { %1316 = vmatpush3.bf16.msra.mxu0 %v1517_v30  ;;  %v1556_v30 = vld [vmem:[#allocation8 + $0x28] sm:$0xff]   ;;  %v1566_v12 = vld [vmem:[#allocation9 + $0x38] sm:$0xff]   ;;  %v1567_v13 = vld [vmem:[#allocation11] sm:$0xff]  }
  0x79   :  { %1338 = vmatpush3.bf16.msra.mxu1 %v1518_v31  ;;  %1345 = vmatprep.subr.bf16.mxu0 %v1519_v44  ;;  %v1557_v31 = vld [vmem:[#allocation8 + $0x30] sm:$0xff]   ;;  %v1568_v14 = vld [vmem:[#allocation11 + $0x8] sm:$0xff]   ;;  %v1265_v19 = vld [vmem:[%s1917_s4] ss:$0 sm:$0xff] }
  0x7a   :  { %1367 = vmatprep.subr.bf16.mxu1 %v1520_v45  ;;  %v1569_v15 = vld [vmem:[#allocation11 + $0x10] sm:$0xff]   ;;  %v1572_v18 = vld [vmem:[#allocation11 + $0x28] sm:$0xff]  }
  0x7b   :  { %679 = vmatmul.mubr.bf16.vlgmr.msra.gmra.mrb[0].mxu0 %v126_v40 }
  0x7c   :  { %720 = vmatmul.mubr.bf16.vlgmr.msra.gmra.mrb[0].mxu1 %v128_v43  ;;  %1346 = vmatpush3.bf16.msra.mxu0 %v1521_v46 }
  0x7d   :  { %1368 = vmatpush3.bf16.msra.mxu1 %v1522_v47  ;;  %1347 = vmatprep.subr.bf16.mxu0 %v1523_v48 }
  0x7e   :  { %1369 = vmatprep.subr.bf16.mxu1 %v1524_v49  ;;  %760 = vmatprep.mubr.bf16.mxu0 %v131_v16  ;;  %v1570_v16 = vld [vmem:[#allocation11 + $0x18] sm:$0xff]  }
  0x7f   :  { %801 = vmatprep.mubr.bf16.mxu1 %v133_v17  ;;  %v1571_v17 = vld [vmem:[#allocation11 + $0x20] sm:$0xff]  }
  0x80   :  { %1348 = vmatpush3.bf16.msra.mxu0 %v1525_v50 }
  0x81   :  { %1370 = vmatpush3.bf16.msra.mxu1 %v1526_v51  ;;  %1349 = vmatprep.subr.bf16.mxu0 %v1527_v52 }
  0x82   :  { %1371 = vmatprep.subr.bf16.mxu1 %v1528_v53 }
  0x84   :  { %1350 = vmatpush3.bf16.msra.mxu0 %v1529_v54 }
  0x85   :  { %1372 = vmatpush3.bf16.msra.mxu1 %v1530_v55  ;;  %1351 = vmatprep.subr.bf16.mxu0 %v1531_v56 }
  0x86   :  { %1373 = vmatprep.subr.bf16.mxu1 %v1532_v57 }
  0x88   :  { %1352 = vmatpush3.bf16.msra.mxu0 %v1533_v58 }
  0x89   :  { %1374 = vmatpush3.bf16.msra.mxu1 %v1534_v59  ;;  %1353 = vmatprep.subr.bf16.mxu0 %v1535_v60 }
  0x8a   :  { %1375 = vmatprep.subr.bf16.mxu1 %v1536_v61 }
  0x8c   :  { %1354 = vmatpush3.bf16.msra.mxu0 %v1537_v62 }
  0x8d   :  { %1376 = vmatpush3.bf16.msra.mxu1 %v1538_v63  ;;  %1355 = vmatprep.subr.bf16.mxu0 %v1539_v0 }
  0x8e   :  { %1377 = vmatprep.subr.bf16.mxu1 %v1540_v1  ;;  %v1264_v1 = vld [vmem:[%s1915_s2] ss:$0 sm:$0xff] }
  0x90   :  { %1356 = vmatpush3.bf16.msra.mxu0 %v1541_v2 }
  0x91   :  { %1378 = vmatpush3.bf16.msra.mxu1 %v1542_v3  ;;  %1357 = vmatprep.subr.bf16.mxu0 %v1543_v4 }
  0x92   :  { %1379 = vmatprep.subr.bf16.mxu1 %v1544_v5 }
  0x94   :  { %1358 = vmatpush3.bf16.msra.mxu0 %v1545_v6 }
  0x95   :  { %1380 = vmatpush3.bf16.msra.mxu1 %v1546_v7  ;;  %1359 = vmatprep.subr.bf16.mxu0 %v1547_v8 }
  0x96   :  { %1381 = vmatprep.subr.bf16.mxu1 %v1548_v9 }
  0x98   :  { %1360 = vmatpush3.bf16.msra.mxu0 %v1549_v10 }
  0x99   :  { %1382 = vmatpush3.bf16.msra.mxu1 %v1550_v11  ;;  %1416 = vmatprep.subr.bf16.mxu0 %v1723_v25  ;;  %v1565_v11 = vld [vmem:[#allocation9 + $0x30] sm:$0xff]  }
  0x9a   :  { %1436 = vmatprep.subr.bf16.mxu1 %v1723_v25 }
  0x9b   :  { %761 = vmatmul.mubr.bf16.vlgmr.msra.gmra.mrb[4].mxu0 %v130_v21 }
  0x9c   :  { %802 = vmatmul.mubr.bf16.vlgmr.msra.gmra.mrb[4].mxu1 %v132_v23  ;;  %1417 = vmatpush3.bf16.msra.mxu0 %v1551_v24 }
  0x9d   :  { %1418 = vmatprep.subr.bf16.mxu0 %v1723_v25  ;;  %1432 = vmatprep.mubr.msk.bf16.mxu0 %vm1724_vm0, %v1723_v25 }
  0x9e   :  { %1452 = vmatprep.mubr.msk.bf16.mxu1 %vm1724_vm0, %v1723_v25  ;;  %1437 = vmatpush3.bf16.msra.mxu1 %v1559_v33 }
  0x9f   :  { %1438 = vmatprep.subr.bf16.mxu1 %v1723_v25 }
  0xa0   :  { %1419 = vmatpush3.bf16.msra.mxu0 %v1552_v26 }
  0xa1   :  { %1420 = vmatprep.subr.bf16.mxu0 %v1723_v25 }
  0xa2   :  { %1439 = vmatpush3.bf16.msra.mxu1 %v1560_v34 }
  0xa3   :  { %1440 = vmatprep.subr.bf16.mxu1 %v1723_v25 }
  0xa4   :  { %1421 = vmatpush3.bf16.msra.mxu0 %v1553_v27 }
  0xa5   :  { %1422 = vmatprep.subr.bf16.mxu0 %v1723_v25 }
  0xa6   :  { %1441 = vmatpush3.bf16.msra.mxu1 %v1561_v35 }
  0xa7   :  { %1442 = vmatprep.subr.bf16.mxu1 %v1723_v25 }
  0xa8   :  { %1423 = vmatpush3.bf16.msra.mxu0 %v1554_v28  ;;  %v1573_v28 = vld [vmem:[#allocation11 + $0x30] sm:$0xff]  }
  0xa9   :  { %1424 = vmatprep.subr.bf16.mxu0 %v1723_v25 }
  0xaa   :  { %1443 = vmatpush3.bf16.msra.mxu1 %v1562_v36 }
  0xab   :  { %1444 = vmatprep.subr.bf16.mxu1 %v1723_v25 }
  0xac   :  { %1425 = vmatpush3.bf16.msra.mxu0 %v1555_v29  ;;  %v1574_v29 = vld [vmem:[#allocation11 + $0x38] sm:$0xff]  }
  0xad   :  { %1426 = vmatprep.subr.bf16.mxu0 %v1723_v25 }
  0xae   :  { %1445 = vmatpush3.bf16.msra.mxu1 %v1563_v37 }
  0xaf   :  { %1446 = vmatprep.subr.bf16.mxu1 %v1723_v25 }
  0xb0   :  { %1427 = vmatpush3.bf16.msra.mxu0 %v1556_v30  ;;  %v1274_v30 = vld [vmem:[%s1919_s6] ss:$0 sm:$0xff]  ;;  %s1685_s6 = scalar_lea.vmem %s1187_s10, 128 }
  0xb1   :  { %1428 = vmatprep.subr.bf16.mxu0 %v1723_v25  ;;  %p1686_p12 = scmp.ne.s32.totalorder %s1187_s10, %s1685_s6  ;;  %p1691_p0 = scmp.lt.s32.totalorder %s1685_s6, %s1685_s6 }
  0xb2   :  { %1447 = vmatpush3.bf16.msra.mxu1 %v1564_v38 }
  0xb3   :  { %1448 = vmatprep.subr.bf16.mxu1 %v1723_v25  ;;  %p1692_p1 = por %p1691_p0, %p1690_p13 }
  0xb4   :  { %1429 = vmatpush3.bf16.msra.mxu0 %v1557_v31 }
  0xb5   :  { %1430 = vmatprep.subr.bf16.mxu0 %v1723_v25  ;;  %p1693_p2 = pnand %p1692_p1, %p1686_p12 }
  0xb6   :  { %1449 = vmatpush3.bf16.msra.mxu1 %v1565_v11 }
  0xb7   :  { %1450 = vmatprep.subr.bf16.mxu1 %v1723_v25 }
  0xb8   :  { %1431 = vmatpush3.bf16.msra.mxu0 %v1558_v32 }
  0xb9   :  { %1456 = vmatprep.subr.bf16.mxu0 %v1723_v25 }
  0xba   :  { %1451 = vmatpush3.bf16.msra.mxu1 %v1566_v12 }
 0x14e   :  { %v1317_v39 = vpop.f32.mrb[0].mxu0 }
 0x14f   :  { %v1339_v40 = vpop.f32.mrb[0].mxu1  ;;  %v1318_v41 = vpop.f32.mrb[1].mxu0 }
 0x150   :  { %v1319_v42 = vadd.f32 %v1318_v41, %v1317_v39  ;;  %v1340_v43 = vpop.f32.mrb[1].mxu1  ;;  %v1320_v44 = vpop.f32.mrb[2].mxu0 }
 0x151   :  { %v1341_v45 = vadd.f32 %v1340_v43, %v1339_v40  ;;  %v1342_v46 = vpop.f32.mrb[2].mxu1  ;;  %v1321_v47 = vpop.f32.mrb[3].mxu0 }
 0x152   :  { %v1322_v48 = vadd.f32 %v1321_v47, %v1320_v44  ;;  %v1343_v49 = vpop.f32.mrb[3].mxu1 }
 0x153   :  { %v722_v50 = vadd.f32 %v1341_v45, %v1319_v42  ;;  %v1344_v51 = vadd.f32 %v1343_v49, %v1342_v46 }
 0x155   :  { %v725_v52 = vadd.f32 %v1344_v51, %v1322_v48 }
 0x16e   :  { %v1361_v53 = vpop.f32.mrb[4].mxu0 }
 0x16f   :  { %v1383_v54 = vpop.f32.mrb[4].mxu1  ;;  %v1362_v55 = vpop.f32.mrb[5].mxu0 }
 0x170   :  { %v1363_v56 = vadd.f32 %v1362_v55, %v1361_v53  ;;  %v1384_v57 = vpop.f32.mrb[5].mxu1  ;;  %v1364_v58 = vpop.f32.mrb[6].mxu0 }
 0x171   :  { %v1385_v59 = vadd.f32 %v1384_v57, %v1383_v54  ;;  %v1386_v60 = vpop.f32.mrb[6].mxu1  ;;  %v1365_v61 = vpop.f32.mrb[7].mxu0 }
 0x172   :  { %v763_v62 = vadd.f32 %v1363_v56, %v722_v50  ;;  %v1366_v63 = vadd.f32 %v1365_v61, %v1364_v58  ;;  %v1387_v0 = vpop.f32.mrb[7].mxu1 }
 0x173   :  { %v1388_v2 = vadd.f32 %v1387_v0, %v1386_v60 }
 0x174   :  { %v804_v3 = vadd.f32 %v1385_v59, %v763_v62  ;;  %v766_v4 = vadd.f32 %v1366_v63, %v725_v52 }
 0x176   :  { %v826_v5 = vadd.f32 %v1264_v1, %v804_v3  ;;  %v807_v6 = vadd.f32 %v1388_v2, %v766_v4 }
 0x178   :  { %v827_v7 = vadd.f32 %v1264_v1, %v807_v6  ;;  %v828_v8 = vmax.f32 %v826_v5, 0.0 }
 0x17a   :  { %v829_v9 = vmax.f32 %v827_v7, 0.0 }
 0x17c   :  { %v830_v10 = vpack.c.bf16 %v829_v9, %v828_v8 }
 0x17e   :  { %1433 = vmatmul.mubr.bf16.vlgmr.msra.gmra.mrb[8].mxu0 %v830_v10 }
 0x17f   :  { %1472 = vmatprep.mubr.msk.bf16.mxu0 %vm1724_vm0, %v1723_v25  ;;  %1457 = vmatpush3.bf16.msra.mxu0 %v1567_v13 }
 0x180   :  { %1458 = vmatprep.subr.bf16.mxu0 %v1723_v25 }
 0x183   :  { %1459 = vmatpush3.bf16.msra.mxu0 %v1568_v14 }
 0x184   :  { %1460 = vmatprep.subr.bf16.mxu0 %v1723_v25 }
 0x187   :  { %1461 = vmatpush3.bf16.msra.mxu0 %v1569_v15 }
 0x188   :  { %1462 = vmatprep.subr.bf16.mxu0 %v1723_v25 }
 0x18b   :  { %1463 = vmatpush3.bf16.msra.mxu0 %v1570_v16 }
 0x18c   :  { %1464 = vmatprep.subr.bf16.mxu0 %v1723_v25 }
 0x18f   :  { %1465 = vmatpush3.bf16.msra.mxu0 %v1571_v17 }
 0x190   :  { %1466 = vmatprep.subr.bf16.mxu0 %v1723_v25 }
 0x193   :  { %1467 = vmatpush3.bf16.msra.mxu0 %v1572_v18 }
 0x194   :  { %1468 = vmatprep.subr.bf16.mxu0 %v1723_v25 }
 0x197   :  { %1469 = vmatpush3.bf16.msra.mxu0 %v1573_v28 }
 0x198   :  { %1470 = vmatprep.subr.bf16.mxu0 %v1723_v25  ;;  %v1283_v25 = vld [vmem:[%s1921_s8] ss:$0 sm:$0xff] }
 0x19b   :  { %1471 = vmatpush3.bf16.msra.mxu0 %v1574_v29 }
 0x251   :  { %v936_v20 = vpop.f32.mrb[8].mxu0 }
 0x252   :  { %v1434_v21 = vpop.f32.mrb[9].mxu0  ;;  %v937_v23 = vadd.f32 %v1265_v19, %v936_v20 }
 0x253   :  { %v939_v22 = vpop.f32.mrb[10].mxu0 }
 0x254   :  { %v940_v24 = vadd.f32 %v1265_v19, %v939_v22  ;;  %v1435_v26 = vpop.f32.mrb[11].mxu0 }
 0x256   :  { %v943_v27 = vpack.c.bf16 %v940_v24, %v937_v23 }
 0x258   :  { %1453 = vmatmul.mubr.bf16.vlgmr.msra.gmra.mrb[8].mxu1 %v943_v27 }
 0x32b   :  { %v1049_v31 = vpop.f32.mrb[8].mxu1 }
 0x32c   :  { %v1050_v32 = vadd.f32 %v1274_v30, %v1049_v31  ;;  %v1454_v33 = vpop.f32.mrb[9].mxu1 }
 0x32d   :  { %v1052_v34 = vpop.f32.mrb[10].mxu1 }
 0x32e   :  { %v1053_v35 = vadd.f32 %v1274_v30, %v1052_v34  ;;  %v1455_v36 = vpop.f32.mrb[11].mxu1  ;;  %v1056_v37 = vmax.f32 %v1050_v32, 0.0 }
 0x330   :  { %v1057_v38 = vmax.f32 %v1053_v35, 0.0 }
 0x332   :  { %v1058_v39 = vpack.c.bf16 %v1057_v38, %v1056_v37 }
 0x334   :  { %1473 = vmatmul.mubr.bf16.vlgmr.msra.gmra.mrb[12].mxu0 %v1058_v39 }
 0x407   :  { %v1164_v40 = vpop.f32.mrb[12].mxu0 }
 0x408   :  { %v1474_v41 = vpop.f32.mrb[13].mxu0  ;;  %v1165_v43 = vadd.f32 %v1283_v25, %v1164_v40 }
 0x409   :  { %v1167_v42 = vpop.f32.mrb[14].mxu0 }
 0x40a   :  { %v1168_v44 = vadd.f32 %v1283_v25, %v1167_v42  ;;  %v1475_v45 = vpop.f32.mrb[15].mxu0 }
 0x40c   :  { %v1299_v46 = vpack.c.bf16 %v1168_v44, %v1165_v43 }
 0x40e   :  { %1300 = vst [vmem:[#allocation12] sm:$0xff] %v1299_v46  }
 0x40f   :  { %1696 = shalt.err (!%p1693_p2)
}
 0x410   :  { %s1697_s15 = scalar_lea.hbm %s1922_s9, 128 }
 0x411   :  { %p1698_p3 = scmp.ne.s32.totalorder %s1922_s9, %s1697_s15  ;;  %p1701_p4 = scmp.lt.u32.totalorder %s1697_s15, %s1922_s9 }
 0x413   :  { %p1703_p5 = pnand %p1701_p4, %p1698_p3 }
 0x415   :  { %1706 = shalt.err (!%p1703_p5)
}
 0x416   :  { %1192 = dma.vmem_to_hbm [thread:$0]  %s1187_s10, 128, %s1922_s9, [#allocation5], %s1716_s19, %s1716_s19, %s1717_s20  }
 0x417   :  { %1713 = dma.done.wait [#allocation5], 128  }
 0x418   :  { %1714 = vsyncadd [#allocation5], 4294967168 }
 0x419   :  { %1196 = vsyncpa [#allocation4], 1 }
 0x41a   :  { %1197 = vsyncpa [#allocation7], 1 }
 0x41b   :  { %1198 = vsyncpa [#allocation10], 1 }
 0x41c   :  { %1199 = vsyncpa [#allocation5], 1 }

// kernel: tpu_custom_call.1
= control target key start
LH: loop header
LB: loop body
LE: loop exit
PB: predicated region body
PF: predicated region fallthrough
CT: control target
= control target key end

     0   :  { %14 = vsyncpa [#allocation4], 0  ;;  %s1913_s0 = inlined_call_operand.hbm [shape: f32[16,1024], index: 0, kind: input, shape index: {}]   ;;  %s1914_s1 = inlined_call_operand.hbm [shape: bf16[1024,128], index: 1, kind: input, shape index: {}]   ;;  %s1915_s2 = inlined_call_operand.vmem [shape: f32[1,128], index: 2, kind: input, shape index: {}]   ;;  %s1916_s3 = inlined_call_operand.hbm [shape: bf16[128,128], index: 3, kind: input, shape index: {}]   ;;  %s1917_s4 = inlined_call_operand.vmem [shape: f32[1,128], index: 4, kind: input, shape index: {}]   ;;  %s1918_s5 = inlined_call_operand.hbm [shape: bf16[128,128], index: 5, kind: input, shape index: {}]   ;;  %s1919_s6 = inlined_call_operand.vmem [shape: f32[1,128], index: 6, kind: input, shape index: {}]   ;;  %s1920_s7 = inlined_call_operand.hbm [shape: bf16[128,128], index: 7, kind: input, shape index: {}]   ;;  %s1921_s8 = inlined_call_operand.vmem [shape: f32[1,128], index: 8, kind: input, shape index: {}]   ;;  %s1922_s9 = inlined_call_operand.hbm [shape: bf16[16,128], index: 9, kind: output, shape index: {}]  }
   0x1   :  { %15 = vsyncpa [#allocation7], 0 }
   0x2   :  { %16 = vsyncpa [#allocation10], 0 }
   0x3   :  { %17 = vsyncpa [#allocation5], 0  ;;  %s1715_s30 = smov [#allocation6]   ;;  %s1575_s13 = scalar_lea.hbm %s1914_s1, 8192 }
   0x4   :  { %s35_s10 = sshll.u32 %s1715_s30, 4  ;;  %p1576_p0 = scmp.ne.s32.totalorder %s1914_s1, %s1575_s13  ;;  %s36_s10 = int_to_ptr.vmem [resolvable:$true] %s35_s10 }
   0x5   :  { %p1579_p1 = scmp.lt.u32.totalorder %s1575_s13, %s1914_s1 }
   0x7   :  { %p1581_p2 = pnand %p1579_p1, %p1576_p0 }
   0x9   :  { %1584 = shalt.err (!%p1581_p2)
}
   0xa   :  { %s1585_s18 = scalar_lea.vmem %s36_s10, 8192  ;;  %p1590_p4 = scmp.lt.s32.totalorder %s36_s10, %s36_s10 }
   0xb   :  { %p1586_p3 = scmp.ne.s32.totalorder %s36_s10, %s1585_s18  ;;  %p1591_p5 = scmp.lt.s32.totalorder %s1585_s18, %s1585_s18 }
   0xd   :  { %p1592_p6 = por %p1591_p5, %p1590_p4 }
   0xf   :  { %p1593_p7 = pnand %p1592_p6, %p1586_p3 }
  0x11   :  { %1596 = shalt.err (!%p1593_p7)
}
  0x12   :  { %s1716_s19 = smov 64   ;;  %s1717_s20 = smov 4  }
  0x13   :  { %41 = dma.hbm_to_vmem [thread:$0]  %s1914_s1, 8192, %s36_s10, [#allocation7], %s1716_s19, %s1716_s19, %s1717_s20  }
  0x14   :  { %s1718_s23 = smov [#allocation9]   ;;  %s1719_s25 = smov [#allocation3]  }
  0x15   :  { %s63_s24 = sshll.u32 %s1718_s23, 4  ;;  %s23_s26 = sshll.u32 %s1719_s25, 4  ;;  %s64_s24 = int_to_ptr.vmem [resolvable:$true] %s63_s24  ;;  %s24_s26 = int_to_ptr.vmem [resolvable:$true] %s23_s26 }
  0x16   :  { %s1597_s29 = scalar_lea.hbm %s1918_s5, 1024 }
  0x17   :  { %p1598_p8 = scmp.ne.s32.totalorder %s1918_s5, %s1597_s29  ;;  %p1601_p9 = scmp.lt.u32.totalorder %s1597_s29, %s1918_s5 }
  0x19   :  { %p1603_p10 = pnand %p1601_p9, %p1598_p8 }
  0x1b   :  { %1606 = shalt.err (!%p1603_p10)
}
  0x1c   :  { %s1607_s1 = scalar_lea.vmem %s64_s24, 1024  ;;  %p1612_p12 = scmp.lt.s32.totalorder %s64_s24, %s64_s24 }
  0x1d   :  { %p1608_p11 = scmp.ne.s32.totalorder %s64_s24, %s1607_s1  ;;  %p1613_p13 = scmp.lt.s32.totalorder %s1607_s1, %s1607_s1 }
  0x1f   :  { %p1614_p0 = por %p1613_p13, %p1612_p12 }
  0x21   :  { %p1615_p1 = pnand %p1614_p0, %p1608_p11 }
  0x23   :  { %1618 = shalt.err (!%p1615_p1)
}
  0x24   :  { %69 = dma.hbm_to_vmem [thread:$0]  %s1918_s5, 1024, %s64_s24, [#allocation10], %s1716_s19, %s1716_s19, %s1717_s20  }
  0x25   :  { %s1619_s17 = scalar_lea.hbm %s1913_s0, 2048 }
  0x26   :  { %p1620_p2 = scmp.ne.s32.totalorder %s1913_s0, %s1619_s17  ;;  %p1623_p3 = scmp.lt.u32.totalorder %s1619_s17, %s1913_s0 }
  0x28   :  { %p1625_p4 = pnand %p1623_p3, %p1620_p2 }
  0x2a   :  { %1628 = shalt.err (!%p1625_p4)
}
  0x2b   :  { %s1629_s25 = scalar_lea.vmem %s24_s26, 2048  ;;  %p1634_p6 = scmp.lt.s32.totalorder %s24_s26, %s24_s26 }
  0x2c   :  { %p1630_p5 = scmp.ne.s32.totalorder %s24_s26, %s1629_s25  ;;  %p1635_p7 = scmp.lt.s32.totalorder %s1629_s25, %s1629_s25 }
  0x2e   :  { %p1636_p8 = por %p1635_p7, %p1634_p6 }
  0x30   :  { %p1637_p9 = pnand %p1636_p8, %p1630_p5 }
  0x32   :  { %1640 = shalt.err (!%p1637_p9)
}
  0x33   :  { %s1720_s5 = smov 1024   ;;  %s1721_s28 = smov [#allocation8]  }
  0x34   :  { %29 = dma.hbm_to_vmem [thread:$0]  %s1913_s0, 2048, %s24_s26, [#allocation4], %s1720_s5, %s1720_s5, %s1716_s19  }
  0x35   :  { %s49_s29 = sshll.u32 %s1721_s28, 4  ;;  %s1722_s30 = smov [#allocation11]   ;;  %s50_s29 = int_to_ptr.vmem [resolvable:$true] %s49_s29 }
  0x36   :  { %s77_s11 = sshll.u32 %s1722_s30, 4  ;;  %s1641_s1 = scalar_lea.hbm %s1916_s3, 1024  ;;  %s1819_s11 = int_to_ptr.vmem [resolvable:$true] %s77_s11 }
  0x37   :  { %p1642_p10 = scmp.ne.s32.totalorder %s1916_s3, %s1641_s1  ;;  %p1645_p11 = scmp.lt.u32.totalorder %s1641_s1, %s1916_s3 }
  0x39   :  { %p1647_p12 = pnand %p1645_p11, %p1642_p10 }
  0x3b   :  { %1650 = shalt.err (!%p1647_p12)
}
  0x3c   :  { %s1651_s0 = scalar_lea.vmem %s50_s29, 1024  ;;  %p1656_p0 = scmp.lt.s32.totalorder %s50_s29, %s50_s29 }
  0x3d   :  { %p1652_p13 = scmp.ne.s32.totalorder %s50_s29, %s1651_s0  ;;  %p1657_p1 = scmp.lt.s32.totalorder %s1651_s0, %s1651_s0 }
  0x3f   :  { %p1658_p2 = por %p1657_p1, %p1656_p0 }
  0x41   :  { %p1659_p3 = pnand %p1658_p2, %p1652_p13 }
  0x43   :  { %1662 = shalt.err (!%p1659_p3)
}
  0x44   :  { %55 = dma.hbm_to_vmem [thread:$0]  %s1916_s3, 1024, %s50_s29, [#allocation7], %s1716_s19, %s1716_s19, %s1717_s20  }
  0x45   :  { %s1663_s22 = scalar_lea.hbm %s1920_s7, 1024 }
  0x46   :  { %p1664_p4 = scmp.ne.s32.totalorder %s1920_s7, %s1663_s22  ;;  %p1667_p5 = scmp.lt.u32.totalorder %s1663_s22, %s1920_s7 }
  0x48   :  { %p1669_p6 = pnand %p1667_p5, %p1664_p4 }
  0x4a   :  { %1672 = shalt.err (!%p1669_p6)
}
  0x4b   :  { %s1673_s27 = scalar_lea.vmem %s1819_s11, 1024  ;;  %p1678_p8 = scmp.lt.s32.totalorder %s1819_s11, %s1819_s11 }
  0x4c   :  { %p1674_p7 = scmp.ne.s32.totalorder %s1819_s11, %s1673_s27  ;;  %p1679_p9 = scmp.lt.s32.totalorder %s1673_s27, %s1673_s27 }
  0x4e   :  { %p1680_p10 = por %p1679_p9, %p1678_p8 }
  0x50   :  { %p1681_p11 = pnand %p1680_p10, %p1674_p7 }
  0x52   :  { %1684 = shalt.err (!%p1681_p11)
}
  0x53   :  { %83 = dma.hbm_to_vmem [thread:$0]  %s1920_s7, 1024, %s1819_s11, [#allocation10], %s1716_s19, %s1716_s19, %s1717_s20  }
  0x54   :  { %1707 = dma.done.wait [#allocation4], 2048  }
  0x55   :  { %1708 = vsyncadd [#allocation4], 4294965248 }
  0x56   :  { %1709 = dma.done.wait [#allocation7], 9216  }
  0x57   :  { %1710 = vsyncadd [#allocation7], 4294958080 }
  0x58   :  { %1711 = dma.done.wait [#allocation10], 2048  }
  0x59   :  { %1712 = vsyncadd [#allocation10], 4294965248  ;;  %v1487_v0 = vld [vmem:[#allocation6 + $0x40] sm:$0xff]   ;;  %v1491_v4 = vld [vmem:[#allocation6 + $0x48] sm:$0xff]   ;;  %vm1724_vm0 = vmmov 0   ;;  %s1725_s1 = smov [#allocation12]  }
  0x5a   :  { %v1488_v1 = vld [vmem:[#allocation6 + $0xc0] sm:$0xff]   ;;  %1301 = vmatprep.subr.bf16.mxu0 %v1487_v0  ;;  %v1492_v5 = vld [vmem:[#allocation6 + $0xc8] sm:$0xff]   ;;  %v1495_v8 = vld [vmem:[#allocation6 + $0x50] sm:$0xff]   ;;  %s1186_s10 = sshll.u32 %s1725_s1, 4  ;;  %s1187_s10 = int_to_ptr.vmem [resolvable:$true] %s1186_s10 }
  0x5b   :  { %v1489_v2 = vld [vmem:[#allocation6] sm:$0xff]   ;;  %1323 = vmatprep.subr.bf16.mxu1 %v1488_v1  ;;  %v1493_v6 = vld [vmem:[#allocation6 + $0x8] sm:$0xff]   ;;  %v1496_v9 = vld [vmem:[#allocation6 + $0xd0] sm:$0xff]   ;;  %p1690_p13 = scmp.lt.s32.totalorder %s1187_s10, %s1187_s10 }
  0x5c   :  { %v1490_v3 = vld [vmem:[#allocation6 + $0x80] sm:$0xff]   ;;  %1302 = vmatpush3.bf16.msra.mxu0 %v1489_v2  ;;  %v1494_v7 = vld [vmem:[#allocation6 + $0x88] sm:$0xff]   ;;  %v1497_v10 = vld [vmem:[#allocation6 + $0x10] sm:$0xff]  }
  0x5d   :  { %1324 = vmatpush3.bf16.msra.mxu1 %v1490_v3  ;;  %1303 = vmatprep.subr.bf16.mxu0 %v1491_v4  ;;  %v1498_v11 = vld [vmem:[#allocation6 + $0x90] sm:$0xff]   ;;  %v1499_v12 = vld [vmem:[#allocation6 + $0x58] sm:$0xff]   ;;  %v1503_v16 = vld [vmem:[#allocation6 + $0x60] sm:$0xff]  }
  0x5e   :  { %1325 = vmatprep.subr.bf16.mxu1 %v1492_v5  ;;  %v1500_v13 = vld [vmem:[#allocation6 + $0xd8] sm:$0xff]   ;;  %v1504_v17 = vld [vmem:[#allocation6 + $0xe0] sm:$0xff]   ;;  %v1507_v20 = vld [vmem:[#allocation6 + $0x68] sm:$0xff]  }
  0x5f   :  { %v1501_v14 = vld [vmem:[#allocation6 + $0x18] sm:$0xff]   ;;  %v1505_v18 = vld [vmem:[#allocation6 + $0x20] sm:$0xff]   ;;  %v1508_v21 = vld [vmem:[#allocation6 + $0xe8] sm:$0xff]  }
  0x60   :  { %1304 = vmatpush3.bf16.msra.mxu0 %v1493_v6  ;;  %v1502_v15 = vld [vmem:[#allocation6 + $0x98] sm:$0xff]   ;;  %v1506_v19 = vld [vmem:[#allocation6 + $0xa0] sm:$0xff]   ;;  %v1509_v22 = vld [vmem:[#allocation6 + $0x28] sm:$0xff]  }
  0x61   :  { %1326 = vmatpush3.bf16.msra.mxu1 %v1494_v7  ;;  %1305 = vmatprep.subr.bf16.mxu0 %v1495_v8  ;;  %v1510_v23 = vld [vmem:[#allocation6 + $0xa8] sm:$0xff]   ;;  %v1511_v24 = vld [vmem:[#allocation6 + $0x70] sm:$0xff]   ;;  %v1515_v28 = vld [vmem:[#allocation6 + $0x78] sm:$0xff]  }
  0x62   :  { %1327 = vmatprep.subr.bf16.mxu1 %v1496_v9  ;;  %v1512_v25 = vld [vmem:[#allocation6 + $0xf0] sm:$0xff]   ;;  %v1516_v29 = vld [vmem:[#allocation6 + $0xf8] sm:$0xff]   ;;  %v111_v32 = vld [vmem:[#allocation3 + $0x8] sm:$0xff] }
  0x63   :  { %v1513_v26 = vld [vmem:[#allocation6 + $0x30] sm:$0xff]   ;;  %v1517_v30 = vld [vmem:[#allocation6 + $0x38] sm:$0xff]   ;;  %v119_v33 = vld [vmem:[#allocation3 + $0x48] sm:$0xff] }
  0x64   :  { %1306 = vmatpush3.bf16.msra.mxu0 %v1497_v10  ;;  %v1514_v27 = vld [vmem:[#allocation6 + $0xb0] sm:$0xff]   ;;  %v1518_v31 = vld [vmem:[#allocation6 + $0xb8] sm:$0xff]   ;;  %v127_v35 = vpack.c.bf16 %v119_v33, %v111_v32  ;;  %v110_v37 = vld [vmem:[#allocation3] sm:$0xff] }
  0x65   :  { %1328 = vmatpush3.bf16.msra.mxu1 %v1498_v11  ;;  %1307 = vmatprep.subr.bf16.mxu0 %v1499_v12  ;;  %v113_v34 = vld [vmem:[#allocation3 + $0x18] sm:$0xff]  ;;  %v118_v38 = vld [vmem:[#allocation3 + $0x40] sm:$0xff]  ;;  %v112_v41 = vld [vmem:[#allocation3 + $0x10] sm:$0xff] }
  0x66   :  { %1329 = vmatprep.subr.bf16.mxu1 %v1500_v13  ;;  %v121_v36 = vld [vmem:[#allocation3 + $0x58] sm:$0xff]  ;;  %v126_v40 = vpack.c.bf16 %v118_v38, %v110_v37  ;;  %v120_v42 = vld [vmem:[#allocation3 + $0x50] sm:$0xff]  ;;  %678 = vmatprep.mubr.bf16.mxu0 %v127_v35  ;;  %v1519_v44 = vld [vmem:[#allocation6 + $0x140] sm:$0xff]  }
  0x67   :  { %v129_v39 = vpack.c.bf16 %v121_v36, %v113_v34  ;;  %v128_v43 = vpack.c.bf16 %v120_v42, %v112_v41  ;;  %v1520_v45 = vld [vmem:[#allocation6 + $0x1c0] sm:$0xff]   ;;  %v1523_v48 = vld [vmem:[#allocation6 + $0x148] sm:$0xff]   ;;  %v1527_v52 = vld [vmem:[#allocation6 + $0x150] sm:$0xff]  }
  0x68   :  { %1308 = vmatpush3.bf16.msra.mxu0 %v1501_v14  ;;  %v1521_v46 = vld [vmem:[#allocation6 + $0x100] sm:$0xff]   ;;  %v1524_v49 = vld [vmem:[#allocation6 + $0x1c8] sm:$0xff]   ;;  %v1528_v53 = vld [vmem:[#allocation6 + $0x1d0] sm:$0xff]  }
  0x69   :  { %1330 = vmatpush3.bf16.msra.mxu1 %v1502_v15  ;;  %1309 = vmatprep.subr.bf16.mxu0 %v1503_v16  ;;  %v1522_v47 = vld [vmem:[#allocation6 + $0x180] sm:$0xff]   ;;  %v1525_v50 = vld [vmem:[#allocation6 + $0x108] sm:$0xff]   ;;  %v1529_v54 = vld [vmem:[#allocation6 + $0x110] sm:$0xff]  }
  0x6a   :  { %1331 = vmatprep.subr.bf16.mxu1 %v1504_v17  ;;  %719 = vmatprep.mubr.bf16.mxu1 %v129_v39  ;;  %v1526_v51 = vld [vmem:[#allocation6 + $0x188] sm:$0xff]   ;;  %v1530_v55 = vld [vmem:[#allocation6 + $0x190] sm:$0xff]   ;;  %v1531_v56 = vld [vmem:[#allocation6 + $0x158] sm:$0xff]  }
  0x6b   :  { %v1532_v57 = vld [vmem:[#allocation6 + $0x1d8] sm:$0xff]   ;;  %v1535_v60 = vld [vmem:[#allocation6 + $0x160] sm:$0xff]   ;;  %v1539_v0 = vld [vmem:[#allocation6 + $0x168] sm:$0xff]  }
  0x6c   :  { %1310 = vmatpush3.bf16.msra.mxu0 %v1505_v18  ;;  %v1533_v58 = vld [vmem:[#allocation6 + $0x118] sm:$0xff]   ;;  %v1536_v61 = vld [vmem:[#allocation6 + $0x1e0] sm:$0xff]   ;;  %v1540_v1 = vld [vmem:[#allocation6 + $0x1e8] sm:$0xff]  }
  0x6d   :  { %1332 = vmatpush3.bf16.msra.mxu1 %v1506_v19  ;;  %1311 = vmatprep.subr.bf16.mxu0 %v1507_v20  ;;  %v1534_v59 = vld [vmem:[#allocation6 + $0x198] sm:$0xff]   ;;  %v1537_v62 = vld [vmem:[#allocation6 + $0x120] sm:$0xff]   ;;  %v1541_v2 = vld [vmem:[#allocation6 + $0x128] sm:$0xff]  }
  0x6e   :  { %1333 = vmatprep.subr.bf16.mxu1 %v1508_v21  ;;  %v1538_v63 = vld [vmem:[#allocation6 + $0x1a0] sm:$0xff]   ;;  %v1542_v3 = vld [vmem:[#allocation6 + $0x1a8] sm:$0xff]   ;;  %v1543_v4 = vld [vmem:[#allocation6 + $0x170] sm:$0xff]  }
  0x6f   :  { %v1544_v5 = vld [vmem:[#allocation6 + $0x1f0] sm:$0xff]   ;;  %v1547_v8 = vld [vmem:[#allocation6 + $0x178] sm:$0xff]   ;;  %v115_v12 = vld [vmem:[#allocation3 + $0x28] sm:$0xff] }
  0x70   :  { %1312 = vmatpush3.bf16.msra.mxu0 %v1509_v22  ;;  %v1545_v6 = vld [vmem:[#allocation6 + $0x130] sm:$0xff]   ;;  %v1548_v9 = vld [vmem:[#allocation6 + $0x1f8] sm:$0xff]   ;;  %v123_v13 = vld [vmem:[#allocation3 + $0x68] sm:$0xff] }
  0x71   :  { %1334 = vmatpush3.bf16.msra.mxu1 %v1510_v23  ;;  %1313 = vmatprep.subr.bf16.mxu0 %v1511_v24  ;;  %v1546_v7 = vld [vmem:[#allocation6 + $0x1b0] sm:$0xff]   ;;  %v1549_v10 = vld [vmem:[#allocation6 + $0x138] sm:$0xff]   ;;  %v131_v16 = vpack.c.bf16 %v123_v13, %v115_v12  ;;  %v114_v18 = vld [vmem:[#allocation3 + $0x20] sm:$0xff] }
  0x72   :  { %1335 = vmatprep.subr.bf16.mxu1 %v1512_v25  ;;  %v1550_v11 = vld [vmem:[#allocation6 + $0x1b8] sm:$0xff]   ;;  %v122_v19 = vld [vmem:[#allocation3 + $0x60] sm:$0xff]  ;;  %v116_v20 = vld [vmem:[#allocation3 + $0x30] sm:$0xff]  ;;  %v1723_v25 = vmov 0.0  }
  0x73   :  { %v117_v14 = vld [vmem:[#allocation3 + $0x38] sm:$0xff]  ;;  %v130_v21 = vpack.c.bf16 %v122_v19, %v114_v18  ;;  %v124_v22 = vld [vmem:[#allocation3 + $0x70] sm:$0xff]  ;;  %v1551_v24 = vld [vmem:[#allocation8] sm:$0xff]  }
  0x74   :  { %1314 = vmatpush3.bf16.msra.mxu0 %v1513_v26  ;;  %v125_v15 = vld [vmem:[#allocation3 + $0x78] sm:$0xff]  ;;  %v132_v23 = vpack.c.bf16 %v124_v22, %v116_v20  ;;  %v1552_v26 = vld [vmem:[#allocation8 + $0x8] sm:$0xff]   ;;  %v1559_v33 = vld [vmem:[#allocation9] sm:$0xff]  }
  0x75   :  { %1336 = vmatpush3.bf16.msra.mxu1 %v1514_v27  ;;  %1315 = vmatprep.subr.bf16.mxu0 %v1515_v28  ;;  %v133_v17 = vpack.c.bf16 %v125_v15, %v117_v14  ;;  %v1553_v27 = vld [vmem:[#allocation8 + $0x10] sm:$0xff]   ;;  %v1554_v28 = vld [vmem:[#allocation8 + $0x18] sm:$0xff]   ;;  %v1560_v34 = vld [vmem:[#allocation9 + $0x8] sm:$0xff]  }
  0x76   :  { %1337 = vmatprep.subr.bf16.mxu1 %v1516_v29  ;;  %v1555_v29 = vld [vmem:[#allocation8 + $0x20] sm:$0xff]   ;;  %v1558_v32 = vld [vmem:[#allocation8 + $0x38] sm:$0xff]   ;;  %v1561_v35 = vld [vmem:[#allocation9 + $0x10] sm:$0xff]  }
  0x77   :  { %v1562_v36 = vld [vmem:[#allocation9 + $0x18] sm:$0xff]   ;;  %v1563_v37 = vld [vmem:[#allocation9 + $0x20] sm:$0xff]   ;;  %v1564_v38 = vld [vmem:[#allocation9 + $0x28] sm:$0xff]  }
  0x78   :  { %1316 = vmatpush3.bf16.msra.mxu0 %v1517_v30  ;;  %v1556_v30 = vld [vmem:[#allocation8 + $0x28] sm:$0xff]   ;;  %v1566_v12 = vld [vmem:[#allocation9 + $0x38] sm:$0xff]   ;;  %v1567_v13 = vld [vmem:[#allocation11] sm:$0xff]  }
  0x79   :  { %1338 = vmatpush3.bf16.msra.mxu1 %v1518_v31  ;;  %1345 = vmatprep.subr.bf16.mxu0 %v1519_v44  ;;  %v1557_v31 = vld [vmem:[#allocation8 + $0x30] sm:$0xff]   ;;  %v1568_v14 = vld [vmem:[#allocation11 + $0x8] sm:$0xff]   ;;  %v1265_v19 = vld [vmem:[%s1917_s4] ss:$0 sm:$0xff] }
  0x7a   :  { %1367 = vmatprep.subr.bf16.mxu1 %v1520_v45  ;;  %v1569_v15 = vld [vmem:[#allocation11 + $0x10] sm:$0xff]   ;;  %v1572_v18 = vld [vmem:[#allocation11 + $0x28] sm:$0xff]  }
  0x7b   :  { %679 = vmatmul.mubr.bf16.vlgmr.msra.gmra.mrb[0].mxu0 %v126_v40 }
  0x7c   :  { %720 = vmatmul.mubr.bf16.vlgmr.msra.gmra.mrb[0].mxu1 %v128_v43  ;;  %1346 = vmatpush3.bf16.msra.mxu0 %v1521_v46 }
  0x7d   :  { %1368 = vmatpush3.bf16.msra.mxu1 %v1522_v47  ;;  %1347 = vmatprep.subr.bf16.mxu0 %v1523_v48 }
  0x7e   :  { %1369 = vmatprep.subr.bf16.mxu1 %v1524_v49  ;;  %760 = vmatprep.mubr.bf16.mxu0 %v131_v16  ;;  %v1570_v16 = vld [vmem:[#allocation11 + $0x18] sm:$0xff]  }
  0x7f   :  { %801 = vmatprep.mubr.bf16.mxu1 %v133_v17  ;;  %v1571_v17 = vld [vmem:[#allocation11 + $0x20] sm:$0xff]  }
  0x80   :  { %1348 = vmatpush3.bf16.msra.mxu0 %v1525_v50 }
  0x81   :  { %1370 = vmatpush3.bf16.msra.mxu1 %v1526_v51  ;;  %1349 = vmatprep.subr.bf16.mxu0 %v1527_v52 }
  0x82   :  { %1371 = vmatprep.subr.bf16.mxu1 %v1528_v53 }
  0x84   :  { %1350 = vmatpush3.bf16.msra.mxu0 %v1529_v54 }
  0x85   :  { %1372 = vmatpush3.bf16.msra.mxu1 %v1530_v55  ;;  %1351 = vmatprep.subr.bf16.mxu0 %v1531_v56 }
  0x86   :  { %1373 = vmatprep.subr.bf16.mxu1 %v1532_v57 }
  0x88   :  { %1352 = vmatpush3.bf16.msra.mxu0 %v1533_v58 }
  0x89   :  { %1374 = vmatpush3.bf16.msra.mxu1 %v1534_v59  ;;  %1353 = vmatprep.subr.bf16.mxu0 %v1535_v60 }
  0x8a   :  { %1375 = vmatprep.subr.bf16.mxu1 %v1536_v61 }
  0x8c   :  { %1354 = vmatpush3.bf16.msra.mxu0 %v1537_v62 }
  0x8d   :  { %1376 = vmatpush3.bf16.msra.mxu1 %v1538_v63  ;;  %1355 = vmatprep.subr.bf16.mxu0 %v1539_v0 }
  0x8e   :  { %1377 = vmatprep.subr.bf16.mxu1 %v1540_v1  ;;  %v1264_v1 = vld [vmem:[%s1915_s2] ss:$0 sm:$0xff] }
  0x90   :  { %1356 = vmatpush3.bf16.msra.mxu0 %v1541_v2 }
  0x91   :  { %1378 = vmatpush3.bf16.msra.mxu1 %v1542_v3  ;;  %1357 = vmatprep.subr.bf16.mxu0 %v1543_v4 }
  0x92   :  { %1379 = vmatprep.subr.bf16.mxu1 %v1544_v5 }
  0x94   :  { %1358 = vmatpush3.bf16.msra.mxu0 %v1545_v6 }
  0x95   :  { %1380 = vmatpush3.bf16.msra.mxu1 %v1546_v7  ;;  %1359 = vmatprep.subr.bf16.mxu0 %v1547_v8 }
  0x96   :  { %1381 = vmatprep.subr.bf16.mxu1 %v1548_v9 }
  0x98   :  { %1360 = vmatpush3.bf16.msra.mxu0 %v1549_v10 }
  0x99   :  { %1382 = vmatpush3.bf16.msra.mxu1 %v1550_v11  ;;  %1416 = vmatprep.subr.bf16.mxu0 %v1723_v25  ;;  %v1565_v11 = vld [vmem:[#allocation9 + $0x30] sm:$0xff]  }
  0x9a   :  { %1436 = vmatprep.subr.bf16.mxu1 %v1723_v25 }
  0x9b   :  { %761 = vmatmul.mubr.bf16.vlgmr.msra.gmra.mrb[4].mxu0 %v130_v21 }
  0x9c   :  { %802 = vmatmul.mubr.bf16.vlgmr.msra.gmra.mrb[4].mxu1 %v132_v23  ;;  %1417 = vmatpush3.bf16.msra.mxu0 %v1551_v24 }
  0x9d   :  { %1418 = vmatprep.subr.bf16.mxu0 %v1723_v25  ;;  %1432 = vmatprep.mubr.msk.bf16.mxu0 %vm1724_vm0, %v1723_v25 }
  0x9e   :  { %1452 = vmatprep.mubr.msk.bf16.mxu1 %vm1724_vm0, %v1723_v25  ;;  %1437 = vmatpush3.bf16.msra.mxu1 %v1559_v33 }
  0x9f   :  { %1438 = vmatprep.subr.bf16.mxu1 %v1723_v25 }
  0xa0   :  { %1419 = vmatpush3.bf16.msra.mxu0 %v1552_v26 }
  0xa1   :  { %1420 = vmatprep.subr.bf16.mxu0 %v1723_v25 }
  0xa2   :  { %1439 = vmatpush3.bf16.msra.mxu1 %v1560_v34 }
  0xa3   :  { %1440 = vmatprep.subr.bf16.mxu1 %v1723_v25 }
  0xa4   :  { %1421 = vmatpush3.bf16.msra.mxu0 %v1553_v27 }
  0xa5   :  { %1422 = vmatprep.subr.bf16.mxu0 %v1723_v25 }
  0xa6   :  { %1441 = vmatpush3.bf16.msra.mxu1 %v1561_v35 }
  0xa7   :  { %1442 = vmatprep.subr.bf16.mxu1 %v1723_v25 }
  0xa8   :  { %1423 = vmatpush3.bf16.msra.mxu0 %v1554_v28  ;;  %v1573_v28 = vld [vmem:[#allocation11 + $0x30] sm:$0xff]  }
  0xa9   :  { %1424 = vmatprep.subr.bf16.mxu0 %v1723_v25 }
  0xaa   :  { %1443 = vmatpush3.bf16.msra.mxu1 %v1562_v36 }
  0xab   :  { %1444 = vmatprep.subr.bf16.mxu1 %v1723_v25 }
  0xac   :  { %1425 = vmatpush3.bf16.msra.mxu0 %v1555_v29  ;;  %v1574_v29 = vld [vmem:[#allocation11 + $0x38] sm:$0xff]  }
  0xad   :  { %1426 = vmatprep.subr.bf16.mxu0 %v1723_v25 }
  0xae   :  { %1445 = vmatpush3.bf16.msra.mxu1 %v1563_v37 }
  0xaf   :  { %1446 = vmatprep.subr.bf16.mxu1 %v1723_v25 }
  0xb0   :  { %1427 = vmatpush3.bf16.msra.mxu0 %v1556_v30  ;;  %v1274_v30 = vld [vmem:[%s1919_s6] ss:$0 sm:$0xff]  ;;  %s1685_s6 = scalar_lea.vmem %s1187_s10, 128 }
  0xb1   :  { %1428 = vmatprep.subr.bf16.mxu0 %v1723_v25  ;;  %p1686_p12 = scmp.ne.s32.totalorder %s1187_s10, %s1685_s6  ;;  %p1691_p0 = scmp.lt.s32.totalorder %s1685_s6, %s1685_s6 }
  0xb2   :  { %1447 = vmatpush3.bf16.msra.mxu1 %v1564_v38 }
  0xb3   :  { %1448 = vmatprep.subr.bf16.mxu1 %v1723_v25  ;;  %p1692_p1 = por %p1691_p0, %p1690_p13 }
  0xb4   :  { %1429 = vmatpush3.bf16.msra.mxu0 %v1557_v31 }
  0xb5   :  { %1430 = vmatprep.subr.bf16.mxu0 %v1723_v25  ;;  %p1693_p2 = pnand %p1692_p1, %p1686_p12 }
  0xb6   :  { %1449 = vmatpush3.bf16.msra.mxu1 %v1565_v11 }
  0xb7   :  { %1450 = vmatprep.subr.bf16.mxu1 %v1723_v25 }
  0xb8   :  { %1431 = vmatpush3.bf16.msra.mxu0 %v1558_v32 }
  0xb9   :  { %1456 = vmatprep.subr.bf16.mxu0 %v1723_v25 }
  0xba   :  { %1451 = vmatpush3.bf16.msra.mxu1 %v1566_v12 }
 0x14e   :  { %v1317_v39 = vpop.f32.mrb[0].mxu0 }
 0x14f   :  { %v1339_v40 = vpop.f32.mrb[0].mxu1  ;;  %v1318_v41 = vpop.f32.mrb[1].mxu0 }
 0x150   :  { %v1319_v42 = vadd.f32 %v1318_v41, %v1317_v39  ;;  %v1340_v43 = vpop.f32.mrb[1].mxu1  ;;  %v1320_v44 = vpop.f32.mrb[2].mxu0 }
 0x151   :  { %v1341_v45 = vadd.f32 %v1340_v43, %v1339_v40  ;;  %v1342_v46 = vpop.f32.mrb[2].mxu1  ;;  %v1321_v47 = vpop.f32.mrb[3].mxu0 }
 0x152   :  { %v1322_v48 = vadd.f32 %v1321_v47, %v1320_v44  ;;  %v1343_v49 = vpop.f32.mrb[3].mxu1 }
 0x153   :  { %v722_v50 = vadd.f32 %v1341_v45, %v1319_v42  ;;  %v1344_v51 = vadd.f32 %v1343_v49, %v1342_v46 }
 0x155   :  { %v725_v52 = vadd.f32 %v1344_v51, %v1322_v48 }
 0x16e   :  { %v1361_v53 = vpop.f32.mrb[4].mxu0 }
 0x16f   :  { %v1383_v54 = vpop.f32.mrb[4].mxu1  ;;  %v1362_v55 = vpop.f32.mrb[5].mxu0 }
 0x170   :  { %v1363_v56 = vadd.f32 %v1362_v55, %v1361_v53  ;;  %v1384_v57 = vpop.f32.mrb[5].mxu1  ;;  %v1364_v58 = vpop.f32.mrb[6].mxu0 }
 0x171   :  { %v1385_v59 = vadd.f32 %v1384_v57, %v1383_v54  ;;  %v1386_v60 = vpop.f32.mrb[6].mxu1  ;;  %v1365_v61 = vpop.f32.mrb[7].mxu0 }
 0x172   :  { %v763_v62 = vadd.f32 %v1363_v56, %v722_v50  ;;  %v1366_v63 = vadd.f32 %v1365_v61, %v1364_v58  ;;  %v1387_v0 = vpop.f32.mrb[7].mxu1 }
 0x173   :  { %v1388_v2 = vadd.f32 %v1387_v0, %v1386_v60 }
 0x174   :  { %v804_v3 = vadd.f32 %v1385_v59, %v763_v62  ;;  %v766_v4 = vadd.f32 %v1366_v63, %v725_v52 }
 0x176   :  { %v826_v5 = vadd.f32 %v1264_v1, %v804_v3  ;;  %v807_v6 = vadd.f32 %v1388_v2, %v766_v4 }
 0x178   :  { %v827_v7 = vadd.f32 %v1264_v1, %v807_v6  ;;  %v828_v8 = vmax.f32 %v826_v5, 0.0 }
 0x17a   :  { %v829_v9 = vmax.f32 %v827_v7, 0.0 }
 0x17c   :  { %v830_v10 = vpack.c.bf16 %v829_v9, %v828_v8 }
 0x17e   :  { %1433 = vmatmul.mubr.bf16.vlgmr.msra.gmra.mrb[8].mxu0 %v830_v10 }
 0x17f   :  { %1472 = vmatprep.mubr.msk.bf16.mxu0 %vm1724_vm0, %v1723_v25  ;;  %1457 = vmatpush3.bf16.msra.mxu0 %v1567_v13 }
 0x180   :  { %1458 = vmatprep.subr.bf16.mxu0 %v1723_v25 }
 0x183   :  { %1459 = vmatpush3.bf16.msra.mxu0 %v1568_v14 }
 0x184   :  { %1460 = vmatprep.subr.bf16.mxu0 %v1723_v25 }
 0x187   :  { %1461 = vmatpush3.bf16.msra.mxu0 %v1569_v15 }
 0x188   :  { %1462 = vmatprep.subr.bf16.mxu0 %v1723_v25 }
 0x18b   :  { %1463 = vmatpush3.bf16.msra.mxu0 %v1570_v16 }
 0x18c   :  { %1464 = vmatprep.subr.bf16.mxu0 %v1723_v25 }
 0x18f   :  { %1465 = vmatpush3.bf16.msra.mxu0 %v1571_v17 }
 0x190   :  { %1466 = vmatprep.subr.bf16.mxu0 %v1723_v25 }
 0x193   :  { %1467 = vmatpush3.bf16.msra.mxu0 %v1572_v18 }
 0x194   :  { %1468 = vmatprep.subr.bf16.mxu0 %v1723_v25 }
 0x197   :  { %1469 = vmatpush3.bf16.msra.mxu0 %v1573_v28 }
 0x198   :  { %1470 = vmatprep.subr.bf16.mxu0 %v1723_v25  ;;  %v1283_v25 = vld [vmem:[%s1921_s8] ss:$0 sm:$0xff] }
 0x19b   :  { %1471 = vmatpush3.bf16.msra.mxu0 %v1574_v29 }
 0x251   :  { %v936_v20 = vpop.f32.mrb[8].mxu0 }
 0x252   :  { %v1434_v21 = vpop.f32.mrb[9].mxu0  ;;  %v937_v23 = vadd.f32 %v1265_v19, %v936_v20 }
 0x253   :  { %v939_v22 = vpop.f32.mrb[10].mxu0 }
 0x254   :  { %v940_v24 = vadd.f32 %v1265_v19, %v939_v22  ;;  %v1435_v26 = vpop.f32.mrb[11].mxu0 }
 0x256   :  { %v943_v27 = vpack.c.bf16 %v940_v24, %v937_v23 }
 0x258   :  { %1453 = vmatmul.mubr.bf16.vlgmr.msra.gmra.mrb[8].mxu1 %v943_v27 }
 0x32b   :  { %v1049_v31 = vpop.f32.mrb[8].mxu1 }
 0x32c   :  { %v1050_v32 = vadd.f32 %v1274_v30, %v1049_v31  ;;  %v1454_v33 = vpop.f32.mrb[9].mxu1 }
 0x32d   :  { %v1052_v34 = vpop.f32.mrb[10].mxu1 }
 0x32e   :  { %v1053_v35 = vadd.f32 %v1274_v30, %v1052_v34  ;;  %v1455_v36 = vpop.f32.mrb[11].mxu1  ;;  %v1056_v37 = vmax.f32 %v1050_v32, 0.0 }
 0x330   :  { %v1057_v38 = vmax.f32 %v1053_v35, 0.0 }
 0x332   :  { %v1058_v39 = vpack.c.bf16 %v1057_v38, %v1056_v37 }
 0x334   :  { %1473 = vmatmul.mubr.bf16.vlgmr.msra.gmra.mrb[12].mxu0 %v1058_v39 }
 0x407   :  { %v1164_v40 = vpop.f32.mrb[12].mxu0 }
 0x408   :  { %v1474_v41 = vpop.f32.mrb[13].mxu0  ;;  %v1165_v43 = vadd.f32 %v1283_v25, %v1164_v40 }
 0x409   :  { %v1167_v42 = vpop.f32.mrb[14].mxu0 }
 0x40a   :  { %v1168_v44 = vadd.f32 %v1283_v25, %v1167_v42  ;;  %v1475_v45 = vpop.f32.mrb[15].mxu0 }
 0x40c   :  { %v1299_v46 = vpack.c.bf16 %v1168_v44, %v1165_v43 }
 0x40e   :  { %1300 = vst [vmem:[#allocation12] sm:$0xff] %v1299_v46  }
 0x40f   :  { %1696 = shalt.err (!%p1693_p2)
}
 0x410   :  { %s1697_s15 = scalar_lea.hbm %s1922_s9, 128 }
 0x411   :  { %p1698_p3 = scmp.ne.s32.totalorder %s1922_s9, %s1697_s15  ;;  %p1701_p4 = scmp.lt.u32.totalorder %s1697_s15, %s1922_s9 }
 0x413   :  { %p1703_p5 = pnand %p1701_p4, %p1698_p3 }
 0x415   :  { %1706 = shalt.err (!%p1703_p5)
}
 0x416   :  { %1192 = dma.vmem_to_hbm [thread:$0]  %s1187_s10, 128, %s1922_s9, [#allocation5], %s1716_s19, %s1716_s19, %s1717_s20  }
 0x417   :  { %1713 = dma.done.wait [#allocation5], 128  }
 0x418   :  { %1714 = vsyncadd [#allocation5], 4294967168 }
 0x419   :  { %1196 = vsyncpa [#allocation4], 1 }
 0x41a   :  { %1197 = vsyncpa [#allocation7], 1 }
 0x41b   :  { %1198 = vsyncpa [#allocation10], 1 }
 0x41c   :  { %1199 = vsyncpa [#allocation5], 1 }

</bundles_post_ra>
